<compile_context>
chip_gen: v5e
topology: v5e:2x2
jax: 0.10.0
libtpu: 0.0.40
codegen_flags: <defaults>
</compile_context>

<pallas_src>
import jax
import jax.numpy as jnp
from jax import lax
from jax.experimental import pallas as pl
from jax.experimental.pallas import tpu as pltpu


def encoder_kernel(
    xpad_ref,                                # [T+4, TB, Cin]  bf16 (zero time halo)
    w1_ref, b1_ref, s1_ref, t1_ref,          # [K*Cin, H] bf16, [1,H] f32 x3
    w2_ref, b2_ref, s2_ref, t2_ref,          # [K*H,  H] bf16, [1,H] f32 x3
    wf1_ref, bf1_ref, wf2_ref, bf2_ref,      # [H,256] bf16, [1,256] f32, [256,128] bf16, [1,128] f32
    out_ref,                                 # [TB, 128] f32 (lane-dense)
    h1pad_ref,                               # scratch [T+4, TB, H] bf16
):
    Tp4, TB, Cin = xpad_ref.shape
    T = Tp4 - 4
    H = h1pad_ref.shape[2]
    K = w1_ref.shape[0] // Cin

    # Chunk the T*TB matmul rows so live im2col operands / matmul results stay in
    # vregs (avoids accumulator/result spills, esp. on v5e's single vst slot).
    tc = max(1, min(T, 256 // TB))
    while T % tc:
        tc -= 1
    n_chunks = T // tc
    rows = tc * TB

    # Zero the conv2 time-halo rows of the persistent scratch. Re-done every grid
    # step (2 tiny stores): scratch is per-core under the "parallel" grid
    # partitioning, so a program_id==0-only init would be unsafe on multi-core chips.
    h1pad_ref[0:2] = jnp.zeros((2, TB, H), h1pad_ref.dtype)
    h1pad_ref[T + 2:T + 4] = jnp.zeros((2, TB, H), h1pad_ref.dtype)

    # ---- Conv1: im2col -> single MXU matmul (contraction K*Cin) per chunk,
    #      fused bias + ReLU + eval-mode BN affine, bf16 write to scratch. ----
    def conv1_chunk(c, carry):
        t0 = c * tc
        a = jnp.concatenate(
            [xpad_ref[pl.ds(t0 + k, tc)].reshape(rows, Cin) for k in range(K)],
            axis=-1)                                                  # [rows, K*Cin] bf16
        acc = jnp.dot(a, w1_ref[...], preferred_element_type=jnp.float32)
        h1 = jnp.maximum(acc + b1_ref[...], 0.0) * s1_ref[...] + t1_ref[...]
        h1pad_ref[pl.ds(2 + t0, tc)] = h1.reshape(tc, TB, H).astype(h1pad_ref.dtype)
        return carry

    lax.fori_loop(0, n_chunks, conv1_chunk, 0)

    # ---- Conv2 (contraction K*H) + temporal sum; mean taken after the loop. ----
    def conv2_chunk(c, pooled_sum):
        t0 = c * tc
        a = jnp.concatenate(
            [h1pad_ref[pl.ds(t0 + k, tc)].reshape(rows, H) for k in range(K)],
            axis=-1)                                                  # [rows, K*H] bf16
        acc = jnp.dot(a, w2_ref[...], preferred_element_type=jnp.float32)
        h2 = jnp.maximum(acc + b2_ref[...], 0.0) * s2_ref[...] + t2_ref[...]
        return pooled_sum + jnp.sum(h2.reshape(tc, TB, H), axis=0)

    pooled = lax.fori_loop(0, n_chunks, conv2_chunk,
                           jnp.zeros((TB, H), jnp.float32)) * (1.0 / T)

    # ---- MLP head: Linear(H,256) -> ReLU -> Linear(256,128). ----
    f1 = jnp.dot(pooled.astype(jnp.bfloat16), wf1_ref[...],
                 preferred_element_type=jnp.float32) + bf1_ref[...]
    f1 = jnp.maximum(f1, 0.0)
    out_ref[...] = jnp.dot(f1.astype(jnp.bfloat16), wf2_ref[...],
                           preferred_element_type=jnp.float32) + bf2_ref[...]


def encoder_forward(x, params, block_b=None):
    """x: [B, input_dim, T] float32 (PyTorch NCL layout). Returns [B, 128] float32."""
    B, Cin, T = x.shape
    K, _, H = params["w1"].shape

    if block_b is None:
        # Prefer >=2 grid steps (v7x has 2 TensorCores), cap the batch tile at 64.
        block_b = max(8, min(64, (B // 2) // 8 * 8))
    assert block_b % 8 == 0 and block_b > 0

    nb = pl.cdiv(B, block_b)
    Bp = nb * block_b

    # bf16 input: halves HBM traffic of the layout change and the kernel's input DMA.
    xb = x.astype(jnp.bfloat16)
    # time-major, channels-last, zero-pad 2 each side of time; pad batch to Bp.
    xpad = jnp.pad(jnp.transpose(xb, (2, 0, 1)), ((2, 2), (0, Bp - B), (0, 0)))

    # im2col-flattened bf16 conv weights; f32 per-channel bias / BN scale / shift.
    w1c = params["w1"].reshape(K * Cin, H).astype(jnp.bfloat16)
    w2c = params["w2"].reshape(K * H, H).astype(jnp.bfloat16)
    wf1 = params["wf1"].astype(jnp.bfloat16)
    wf2 = params["wf2"].astype(jnp.bfloat16)

    def resident(shape):
        # full-extent block + constant index_map -> stays resident in VMEM,
        # no per-grid-step weight DMA.
        return pl.BlockSpec(shape, lambda i, _n=len(shape): (0,) * _n)

    in_specs = [
        pl.BlockSpec((T + 4, block_b, Cin), lambda i: (0, i, 0)),
        resident((K * Cin, H)), resident((1, H)), resident((1, H)), resident((1, H)),
        resident((K * H, H)),   resident((1, H)), resident((1, H)), resident((1, H)),
        resident((H, 256)), resident((1, 256)),
        resident((256, 128)), resident((1, 128)),
    ]

    flops = 2 * Bp * T * (K * Cin * H + K * H * H) + 2 * Bp * (H * 256 + 256 * 128)
    bytes_accessed = (xpad.size * 2
                      + (w1c.size + w2c.size + wf1.size + wf2.size) * 2
                      + (6 * H + 256 + 128) * 4 + Bp * 128 * 4)

    out = pl.pallas_call(
        encoder_kernel,
        out_shape=jax.ShapeDtypeStruct((Bp, 128), jnp.float32),
        grid=(nb,),
        in_specs=in_specs,
        out_specs=pl.BlockSpec((block_b, 128), lambda i: (i, 0)),
        scratch_shapes=[pltpu.VMEM((T + 4, block_b, H), jnp.bfloat16)],
        compiler_params=pltpu.CompilerParams(dimension_semantics=("parallel",)),
        cost_estimate=pl.CostEstimate(flops=int(flops), transcendentals=0,
                                      bytes_accessed=int(bytes_accessed)),
    )(xpad,
      w1c, params["b1"], params["s1"], params["t1"],
      w2c, params["b2"], params["s2"], params["t2"],
      wf1, params["bf1"], wf2, params["bf2"])

    return out[:B] if Bp != B else out


def init_params(key, input_dim, hidden_dim, eps=1e-5):
    """Deterministic synthetic parameters. Conv weights stored as [K, Cin, Cout]."""
    K = 5
    keys = iter(jax.random.split(key, 16))

    def nrm(shape, scale):
        return scale * jax.random.normal(next(keys), shape, dtype=jnp.float32)

    p = {
        "w1": nrm((K, input_dim, hidden_dim), 0.1),
        "b1": nrm((1, hidden_dim), 0.05),
        "w2": nrm((K, hidden_dim, hidden_dim), 0.1),
        "b2": nrm((1, hidden_dim), 0.05),
        "wf1": nrm((hidden_dim, 256), 0.1),
        "bf1": nrm((1, 256), 0.05),
        "wf2": nrm((256, 128), 0.1),
        "bf2": nrm((1, 128), 0.05),
    }
    # BatchNorm1d (eval mode) folded into per-channel scale/shift.
    for i in (1, 2):
        gamma = 1.0 + nrm((1, hidden_dim), 0.1)
        beta = nrm((1, hidden_dim), 0.05)
        mean = nrm((1, hidden_dim), 0.1)
        var = jnp.abs(nrm((1, hidden_dim), 0.2)) + 0.5
        scale = gamma * lax.rsqrt(var + eps)
        p[f"s{i}"] = scale
        p[f"t{i}"] = beta - mean * scale
    return p


def encoder_reference(x, p):
    """Independent pure-JAX (XLA) reference mirroring the kernel's bf16-operand /
    f32-accumulate numerics: matmul/conv operands quantized to bf16, math in f32."""
    bf = lambda a: a.astype(jnp.bfloat16).astype(jnp.float32)
    hi = lax.Precision.HIGHEST

    def conv_block(y, w_kio, b, s, t):
        w = jnp.transpose(bf(w_kio), (2, 1, 0))            # [K,Cin,Cout] -> [Cout,Cin,K]
        y = lax.conv(bf(y), w, window_strides=(1,), padding="SAME", precision=hi)
        y = jnp.maximum(y + b.reshape(1, -1, 1), 0.0)
        return y * s.reshape(1, -1, 1) + t.reshape(1, -1, 1)

    y = conv_block(x, p["w1"], p["b1"], p["s1"], p["t1"])
    y = conv_block(y, p["w2"], p["b2"], p["s2"], p["t2"])
    pooled = jnp.mean(y, axis=2)                            # [B, H]
    f = jnp.maximum(jnp.dot(bf(pooled), bf(p["wf1"]), precision=hi) + p["bf1"], 0.0)
    return jnp.dot(bf(f), bf(p["wf2"]), precision=hi) + p["bf2"]


if __name__ == "__main__":
    batch, input_dim, hidden_dim, seq_len = 16, 16, 32, 64

    key = jax.random.PRNGKey(0)
    kx, kp = jax.random.split(key)
    x = jax.random.normal(kx, (batch, input_dim, seq_len), dtype=jnp.float32)
    params = init_params(kp, input_dim, hidden_dim)

    out = jax.block_until_ready(encoder_forward(x, params))   # default block_b=8 -> 2 grid steps

    ref = encoder_reference(x, params)
    assert out.shape == (batch, 128)
    max_err = float(jnp.max(jnp.abs(out - ref)))
    assert jnp.allclose(out, ref, atol=1e-2, rtol=1e-2), max_err

    print("KERNEL_OK")
</pallas_src>

<mosaic_0001>
module attributes {stable_mosaic.version = 11 : i64} {
  func.func @encoder_kernel(%arg0: i32, %arg1: memref<68x8x16xbf16, #tpu.memory_space<vmem>>, %arg2: memref<80x32xbf16, #tpu.memory_space<vmem>>, %arg3: memref<1x32xf32, #tpu.memory_space<vmem>>, %arg4: memref<1x32xf32, #tpu.memory_space<vmem>>, %arg5: memref<1x32xf32, #tpu.memory_space<vmem>>, %arg6: memref<160x32xbf16, #tpu.memory_space<vmem>>, %arg7: memref<1x32xf32, #tpu.memory_space<vmem>>, %arg8: memref<1x32xf32, #tpu.memory_space<vmem>>, %arg9: memref<1x32xf32, #tpu.memory_space<vmem>>, %arg10: memref<32x256xbf16, #tpu.memory_space<vmem>>, %arg11: memref<1x256xf32, #tpu.memory_space<vmem>>, %arg12: memref<256x128xbf16, #tpu.memory_space<vmem>>, %arg13: memref<1x128xf32, #tpu.memory_space<vmem>>, %arg14: memref<8x128xf32, #tpu.memory_space<vmem>>, %arg15: memref<68x8x32xbf16, #tpu.memory_space<vmem>>) attributes {dimension_semantics = [#tpu.dimension_semantics<parallel>], iteration_bounds = array<i64: 2>, scalar_prefetch = 0 : i64, scratch_operands = 1 : i64, tpu.core_type = #tpu.core_type<tc>, window_params = [{transform_indices = @transform_0, window_bounds = array<i64: 68, 8, 16>}, {pipeline_mode = #tpu.pipeline_mode<synchronous>, transform_indices = @transform_1, window_bounds = array<i64: 80, 32>}, {pipeline_mode = #tpu.pipeline_mode<synchronous>, transform_indices = @transform_2, window_bounds = array<i64: 1, 32>}, {pipeline_mode = #tpu.pipeline_mode<synchronous>, transform_indices = @transform_3, window_bounds = array<i64: 1, 32>}, {pipeline_mode = #tpu.pipeline_mode<synchronous>, transform_indices = @transform_4, window_bounds = array<i64: 1, 32>}, {pipeline_mode = #tpu.pipeline_mode<synchronous>, transform_indices = @transform_5, window_bounds = array<i64: 160, 32>}, {pipeline_mode = #tpu.pipeline_mode<synchronous>, transform_indices = @transform_6, window_bounds = array<i64: 1, 32>}, {pipeline_mode = #tpu.pipeline_mode<synchronous>, transform_indices = @transform_7, window_bounds = array<i64: 1, 32>}, {pipeline_mode = #tpu.pipeline_mode<synchronous>, transform_indices = @transform_8, window_bounds = array<i64: 1, 32>}, {pipeline_mode = #tpu.pipeline_mode<synchronous>, transform_indices = @transform_9, window_bounds = array<i64: 32, 256>}, {pipeline_mode = #tpu.pipeline_mode<synchronous>, transform_indices = @transform_10, window_bounds = array<i64: 1, 256>}, {pipeline_mode = #tpu.pipeline_mode<synchronous>, transform_indices = @transform_11, window_bounds = array<i64: 256, 128>}, {pipeline_mode = #tpu.pipeline_mode<synchronous>, transform_indices = @transform_12, window_bounds = array<i64: 1, 128>}, {transform_indices = @transform_13, window_bounds = array<i64: 8, 128>}]} {
    %cst = arith.constant 0.000000e+00 : bf16
    %0 = vector.broadcast %cst : bf16 to vector<2x8x32xbf16>
    %c0 = arith.constant 0 : index
    %c0_0 = arith.constant 0 : index
    %c0_1 = arith.constant 0 : index
    %1 = vector.load %arg15[%c0, %c0_0, %c0_1] : memref<68x8x32xbf16, #tpu.memory_space<vmem>>, vector<2x8x32xbf16>
    tpu.vector_store %arg15[%c0, %c0_0, %c0_1], %0 {strides = array<i32>} : memref<68x8x32xbf16, #tpu.memory_space<vmem>>, vector<2x8x32xbf16>,
    %cst_2 = arith.constant 0.000000e+00 : bf16
    %2 = vector.broadcast %cst_2 : bf16 to vector<2x8x32xbf16>
    %c66 = arith.constant 66 : index
    %c0_3 = arith.constant 0 : index
    %c0_4 = arith.constant 0 : index
    %3 = vector.load %arg15[%c66, %c0_3, %c0_4] : memref<68x8x32xbf16, #tpu.memory_space<vmem>>, vector<2x8x32xbf16>
    tpu.vector_store %arg15[%c66, %c0_3, %c0_4], %2 {strides = array<i32>} : memref<68x8x32xbf16, #tpu.memory_space<vmem>>, vector<2x8x32xbf16>,
    %c0_i32 = arith.constant 0 : i32
    %c2_i32 = arith.constant 2 : i32
    %4 = arith.addi %c0_i32, %c2_i32 : i32
    %c1_i32 = arith.constant 1 : i32
    scf.for %arg16 = %c0_i32 to %4 step %c1_i32  : i32 {
      %c32_i32 = arith.constant 32 : i32
      %25 = arith.muli %arg16, %c32_i32 : i32
      %c0_i32_25 = arith.constant 0 : i32
      %26 = arith.addi %25, %c0_i32_25 : i32
      %27 = arith.index_cast %26 : i32 to index
      %c0_26 = arith.constant 0 : index
      %c0_27 = arith.constant 0 : index
      %28 = vector.load %arg1[%27, %c0_26, %c0_27] : memref<68x8x16xbf16, #tpu.memory_space<vmem>>, vector<32x8x16xbf16>
      %29 = vector.shape_cast %28 : vector<32x8x16xbf16> to vector<256x16xbf16>
      %c1_i32_28 = arith.constant 1 : i32
      %30 = arith.addi %25, %c1_i32_28 : i32
      %31 = arith.index_cast %30 : i32 to index
      %c0_29 = arith.constant 0 : index
      %c0_30 = arith.constant 0 : index
      %32 = vector.load %arg1[%31, %c0_29, %c0_30] : memref<68x8x16xbf16, #tpu.memory_space<vmem>>, vector<32x8x16xbf16>
      %33 = vector.shape_cast %32 : vector<32x8x16xbf16> to vector<256x16xbf16>
      %c2_i32_31 = arith.constant 2 : i32
      %34 = arith.addi %25, %c2_i32_31 : i32
      %35 = arith.index_cast %34 : i32 to index
      %c0_32 = arith.constant 0 : index
      %c0_33 = arith.constant 0 : index
      %36 = vector.load %arg1[%35, %c0_32, %c0_33] : memref<68x8x16xbf16, #tpu.memory_space<vmem>>, vector<32x8x16xbf16>
      %37 = vector.shape_cast %36 : vector<32x8x16xbf16> to vector<256x16xbf16>
      %c3_i32 = arith.constant 3 : i32
      %38 = arith.addi %25, %c3_i32 : i32
      %39 = arith.index_cast %38 : i32 to index
      %c0_34 = arith.constant 0 : index
      %c0_35 = arith.constant 0 : index
      %40 = vector.load %arg1[%39, %c0_34, %c0_35] : memref<68x8x16xbf16, #tpu.memory_space<vmem>>, vector<32x8x16xbf16>
      %41 = vector.shape_cast %40 : vector<32x8x16xbf16> to vector<256x16xbf16>
      %c4_i32 = arith.constant 4 : i32
      %42 = arith.addi %25, %c4_i32 : i32
      %43 = arith.index_cast %42 : i32 to index
      %c0_36 = arith.constant 0 : index
      %c0_37 = arith.constant 0 : index
      %44 = vector.load %arg1[%43, %c0_36, %c0_37] : memref<68x8x16xbf16, #tpu.memory_space<vmem>>, vector<32x8x16xbf16>
      %45 = vector.shape_cast %44 : vector<32x8x16xbf16> to vector<256x16xbf16>
      %46 = tpu.concatenate %29, %33, %37, %41, %45 in 1 : vector<256x16xbf16>, vector<256x16xbf16>, vector<256x16xbf16>, vector<256x16xbf16>, vector<256x16xbf16> -> vector<256x80xbf16>
      %c0_38 = arith.constant 0 : index
      %c0_39 = arith.constant 0 : index
      %47 = vector.load %arg2[%c0_38, %c0_39] : memref<80x32xbf16, #tpu.memory_space<vmem>>, vector<80x32xbf16>
      %cst_40 = arith.constant dense<0.000000e+00> : vector<256x32xf32>
      %48 = tpu.matmul %46, %47, %cst_40 {dimension_numbers = #tpu.dot_dimension_numbers<[1], [0], [0], [1], [0, 0, 1, 1], [], []>} : vector<256x80xbf16>, vector<80x32xbf16>, vector<256x32xf32> -> vector<256x32xf32>
      %c0_41 = arith.constant 0 : index
      %c0_42 = arith.constant 0 : index
      %49 = vector.load %arg3[%c0_41, %c0_42] : memref<1x32xf32, #tpu.memory_space<vmem>>, vector<1x32xf32>
      %50 = vector.broadcast %49 : vector<1x32xf32> to vector<256x32xf32>
      %51 = arith.addf %48, %50 : vector<256x32xf32>
      %cst_43 = arith.constant 0.000000e+00 : f32
      %52 = vector.broadcast %cst_43 : f32 to vector<256x32xf32>
      %53 = arith.maximumf %51, %52 : vector<256x32xf32>
      %c0_44 = arith.constant 0 : index
      %c0_45 = arith.constant 0 : index
      %54 = vector.load %arg4[%c0_44, %c0_45] : memref<1x32xf32, #tpu.memory_space<vmem>>, vector<1x32xf32>
      %55 = vector.broadcast %54 : vector<1x32xf32> to vector<256x32xf32>
      %56 = arith.mulf %53, %55 : vector<256x32xf32>
      %c0_46 = arith.constant 0 : index
      %c0_47 = arith.constant 0 : index
      %57 = vector.load %arg5[%c0_46, %c0_47] : memref<1x32xf32, #tpu.memory_space<vmem>>, vector<1x32xf32>
      %58 = vector.broadcast %57 : vector<1x32xf32> to vector<256x32xf32>
      %59 = arith.addf %56, %58 : vector<256x32xf32>
      %60 = vector.shape_cast %59 : vector<256x32xf32> to vector<32x8x32xf32>
      %61 = arith.truncf %60 : vector<32x8x32xf32> to vector<32x8x32xbf16>
      %c2_i32_48 = arith.constant 2 : i32
      %62 = arith.addi %c2_i32_48, %25 : i32
      %63 = arith.index_cast %62 : i32 to index
      %c0_49 = arith.constant 0 : index
      %c0_50 = arith.constant 0 : index
      %64 = vector.load %arg15[%63, %c0_49, %c0_50] : memref<68x8x32xbf16, #tpu.memory_space<vmem>>, vector<32x8x32xbf16>
      tpu.vector_store %arg15[%63, %c0_49, %c0_50], %61 {strides = array<i32>} : memref<68x8x32xbf16, #tpu.memory_space<vmem>>, vector<32x8x32xbf16>,
    }
    %c2_i32_5 = arith.constant 2 : i32
    %cst_6 = arith.constant 0.000000e+00 : f32
    %5 = vector.broadcast %cst_6 : f32 to vector<8x32xf32>
    %c0_i32_7 = arith.constant 0 : i32
    %c2_i32_8 = arith.constant 2 : i32
    %6 = arith.addi %c0_i32_7, %c2_i32_8 : i32
    %c1_i32_9 = arith.constant 1 : i32
    %7 = scf.for %arg16 = %c0_i32_7 to %6 step %c1_i32_9 iter_args(%arg17 = %5) -> (vector<8x32xf32>)  : i32 {
      %c32_i32 = arith.constant 32 : i32
      %25 = arith.muli %arg16, %c32_i32 : i32
      %c0_i32_25 = arith.constant 0 : i32
      %26 = arith.addi %25, %c0_i32_25 : i32
      %27 = arith.index_cast %26 : i32 to index
      %c0_26 = arith.constant 0 : index
      %c0_27 = arith.constant 0 : index
      %28 = vector.load %arg15[%27, %c0_26, %c0_27] : memref<68x8x32xbf16, #tpu.memory_space<vmem>>, vector<32x8x32xbf16>
      %29 = vector.shape_cast %28 : vector<32x8x32xbf16> to vector<256x32xbf16>
      %c1_i32_28 = arith.constant 1 : i32
      %30 = arith.addi %25, %c1_i32_28 : i32
      %31 = arith.index_cast %30 : i32 to index
      %c0_29 = arith.constant 0 : index
      %c0_30 = arith.constant 0 : index
      %32 = vector.load %arg15[%31, %c0_29, %c0_30] : memref<68x8x32xbf16, #tpu.memory_space<vmem>>, vector<32x8x32xbf16>
      %33 = vector.shape_cast %32 : vector<32x8x32xbf16> to vector<256x32xbf16>
      %c2_i32_31 = arith.constant 2 : i32
      %34 = arith.addi %25, %c2_i32_31 : i32
      %35 = arith.index_cast %34 : i32 to index
      %c0_32 = arith.constant 0 : index
      %c0_33 = arith.constant 0 : index
      %36 = vector.load %arg15[%35, %c0_32, %c0_33] : memref<68x8x32xbf16, #tpu.memory_space<vmem>>, vector<32x8x32xbf16>
      %37 = vector.shape_cast %36 : vector<32x8x32xbf16> to vector<256x32xbf16>
      %c3_i32 = arith.constant 3 : i32
      %38 = arith.addi %25, %c3_i32 : i32
      %39 = arith.index_cast %38 : i32 to index
      %c0_34 = arith.constant 0 : index
      %c0_35 = arith.constant 0 : index
      %40 = vector.load %arg15[%39, %c0_34, %c0_35] : memref<68x8x32xbf16, #tpu.memory_space<vmem>>, vector<32x8x32xbf16>
      %41 = vector.shape_cast %40 : vector<32x8x32xbf16> to vector<256x32xbf16>
      %c4_i32 = arith.constant 4 : i32
      %42 = arith.addi %25, %c4_i32 : i32
      %43 = arith.index_cast %42 : i32 to index
      %c0_36 = arith.constant 0 : index
      %c0_37 = arith.constant 0 : index
      %44 = vector.load %arg15[%43, %c0_36, %c0_37] : memref<68x8x32xbf16, #tpu.memory_space<vmem>>, vector<32x8x32xbf16>
      %45 = vector.shape_cast %44 : vector<32x8x32xbf16> to vector<256x32xbf16>
      %46 = tpu.concatenate %29, %33, %37, %41, %45 in 1 : vector<256x32xbf16>, vector<256x32xbf16>, vector<256x32xbf16>, vector<256x32xbf16>, vector<256x32xbf16> -> vector<256x160xbf16>
      %c0_38 = arith.constant 0 : index
      %c0_39 = arith.constant 0 : index
      %47 = vector.load %arg6[%c0_38, %c0_39] : memref<160x32xbf16, #tpu.memory_space<vmem>>, vector<160x32xbf16>
      %cst_40 = arith.constant dense<0.000000e+00> : vector<256x32xf32>
      %48 = tpu.matmul %46, %47, %cst_40 {dimension_numbers = #tpu.dot_dimension_numbers<[1], [0], [0], [1], [0, 0, 1, 1], [], []>} : vector<256x160xbf16>, vector<160x32xbf16>, vector<256x32xf32> -> vector<256x32xf32>
      %c0_41 = arith.constant 0 : index
      %c0_42 = arith.constant 0 : index
      %49 = vector.load %arg7[%c0_41, %c0_42] : memref<1x32xf32, #tpu.memory_space<vmem>>, vector<1x32xf32>
      %50 = vector.broadcast %49 : vector<1x32xf32> to vector<256x32xf32>
      %51 = arith.addf %48, %50 : vector<256x32xf32>
      %cst_43 = arith.constant 0.000000e+00 : f32
      %52 = vector.broadcast %cst_43 : f32 to vector<256x32xf32>
      %53 = arith.maximumf %51, %52 : vector<256x32xf32>
      %c0_44 = arith.constant 0 : index
      %c0_45 = arith.constant 0 : index
      %54 = vector.load %arg8[%c0_44, %c0_45] : memref<1x32xf32, #tpu.memory_space<vmem>>, vector<1x32xf32>
      %55 = vector.broadcast %54 : vector<1x32xf32> to vector<256x32xf32>
      %56 = arith.mulf %53, %55 : vector<256x32xf32>
      %c0_46 = arith.constant 0 : index
      %c0_47 = arith.constant 0 : index
      %57 = vector.load %arg9[%c0_46, %c0_47] : memref<1x32xf32, #tpu.memory_space<vmem>>, vector<1x32xf32>
      %58 = vector.broadcast %57 : vector<1x32xf32> to vector<256x32xf32>
      %59 = arith.addf %56, %58 : vector<256x32xf32>
      %60 = vector.shape_cast %59 : vector<256x32xf32> to vector<32x8x32xf32>
      %cst_48 = arith.constant dense<0.000000e+00> : vector<8x32xf32>
      %61 = vector.multi_reduction <add>, %60, %cst_48 [0] : vector<32x8x32xf32> to vector<8x32xf32>
      %62 = arith.addf %arg17, %61 : vector<8x32xf32>
      scf.yield %62 : vector<8x32xf32>
    }
    %c2_i32_10 = arith.constant 2 : i32
    %cst_11 = arith.constant 1.562500e-02 : f32
    %8 = vector.broadcast %cst_11 : f32 to vector<8x32xf32>
    %9 = arith.mulf %7, %8 : vector<8x32xf32>
    %10 = arith.truncf %9 : vector<8x32xf32> to vector<8x32xbf16>
    %c0_12 = arith.constant 0 : index
    %c0_13 = arith.constant 0 : index
    %11 = vector.load %arg10[%c0_12, %c0_13] : memref<32x256xbf16, #tpu.memory_space<vmem>>, vector<32x256xbf16>
    %cst_14 = arith.constant dense<0.000000e+00> : vector<8x256xf32>
    %12 = tpu.matmul %10, %11, %cst_14 {dimension_numbers = #tpu.dot_dimension_numbers<[1], [0], [0], [1], [0, 0, 1, 1], [], []>} : vector<8x32xbf16>, vector<32x256xbf16>, vector<8x256xf32> -> vector<8x256xf32>
    %c0_15 = arith.constant 0 : index
    %c0_16 = arith.constant 0 : index
    %13 = vector.load %arg11[%c0_15, %c0_16] : memref<1x256xf32, #tpu.memory_space<vmem>>, vector<1x256xf32>
    %14 = vector.broadcast %13 : vector<1x256xf32> to vector<8x256xf32>
    %15 = arith.addf %12, %14 : vector<8x256xf32>
    %cst_17 = arith.constant 0.000000e+00 : f32
    %16 = vector.broadcast %cst_17 : f32 to vector<8x256xf32>
    %17 = arith.maximumf %15, %16 : vector<8x256xf32>
    %18 = arith.truncf %17 : vector<8x256xf32> to vector<8x256xbf16>
    %c0_18 = arith.constant 0 : index
    %c0_19 = arith.constant 0 : index
    %19 = vector.load %arg12[%c0_18, %c0_19] : memref<256x128xbf16, #tpu.memory_space<vmem>>, vector<256x128xbf16>
    %cst_20 = arith.constant dense<0.000000e+00> : vector<8x128xf32>
    %20 = tpu.matmul %18, %19, %cst_20 {dimension_numbers = #tpu.dot_dimension_numbers<[1], [0], [0], [1], [0, 0, 1, 1], [], []>} : vector<8x256xbf16>, vector<256x128xbf16>, vector<8x128xf32> -> vector<8x128xf32>
    %c0_21 = arith.constant 0 : index
    %c0_22 = arith.constant 0 : index
    %21 = vector.load %arg13[%c0_21, %c0_22] : memref<1x128xf32, #tpu.memory_space<vmem>>, vector<1x128xf32>
    %22 = vector.broadcast %21 : vector<1x128xf32> to vector<8x128xf32>
    %23 = arith.addf %20, %22 : vector<8x128xf32>
    %c0_23 = arith.constant 0 : index
    %c0_24 = arith.constant 0 : index
    %24 = vector.load %arg14[%c0_23, %c0_24] : memref<8x128xf32, #tpu.memory_space<vmem>>, vector<8x128xf32>
    tpu.vector_store %arg14[%c0_23, %c0_24], %23 {strides = array<i32>} : memref<8x128xf32, #tpu.memory_space<vmem>>, vector<8x128xf32>,
    return
  }
  func.func @transform_0(%arg0: i32) -> (i32, i32, i32) {
    %c0_i32 = arith.constant 0 : i32
    %c0_i32_0 = arith.constant 0 : i32
    %c0_i32_1 = arith.constant 0 : i32
    return %c0_i32, %arg0, %c0_i32_0 : i32, i32, i32
  }
  func.func @transform_1(%arg0: i32) -> (i32, i32) {
    %c0_i32 = arith.constant 0 : i32
    %c0_i32_0 = arith.constant 0 : i32
    %c0_i32_1 = arith.constant 0 : i32
    return %c0_i32, %c0_i32_0 : i32, i32
  }
  func.func @transform_2(%arg0: i32) -> (i32, i32) {
    %c0_i32 = arith.constant 0 : i32
    %c0_i32_0 = arith.constant 0 : i32
    %c0_i32_1 = arith.constant 0 : i32
    return %c0_i32, %c0_i32_0 : i32, i32
  }
  func.func @transform_3(%arg0: i32) -> (i32, i32) {
    %c0_i32 = arith.constant 0 : i32
    %c0_i32_0 = arith.constant 0 : i32
    %c0_i32_1 = arith.constant 0 : i32
    return %c0_i32, %c0_i32_0 : i32, i32
  }
  func.func @transform_4(%arg0: i32) -> (i32, i32) {
    %c0_i32 = arith.constant 0 : i32
    %c0_i32_0 = arith.constant 0 : i32
    %c0_i32_1 = arith.constant 0 : i32
    return %c0_i32, %c0_i32_0 : i32, i32
  }
  func.func @transform_5(%arg0: i32) -> (i32, i32) {
    %c0_i32 = arith.constant 0 : i32
    %c0_i32_0 = arith.constant 0 : i32
    %c0_i32_1 = arith.constant 0 : i32
    return %c0_i32, %c0_i32_0 : i32, i32
  }
  func.func @transform_6(%arg0: i32) -> (i32, i32) {
    %c0_i32 = arith.constant 0 : i32
    %c0_i32_0 = arith.constant 0 : i32
    %c0_i32_1 = arith.constant 0 : i32
    return %c0_i32, %c0_i32_0 : i32, i32
  }
  func.func @transform_7(%arg0: i32) -> (i32, i32) {
    %c0_i32 = arith.constant 0 : i32
    %c0_i32_0 = arith.constant 0 : i32
    %c0_i32_1 = arith.constant 0 : i32
    return %c0_i32, %c0_i32_0 : i32, i32
  }
  func.func @transform_8(%arg0: i32) -> (i32, i32) {
    %c0_i32 = arith.constant 0 : i32
    %c0_i32_0 = arith.constant 0 : i32
    %c0_i32_1 = arith.constant 0 : i32
    return %c0_i32, %c0_i32_0 : i32, i32
  }
  func.func @transform_9(%arg0: i32) -> (i32, i32) {
    %c0_i32 = arith.constant 0 : i32
    %c0_i32_0 = arith.constant 0 : i32
    %c0_i32_1 = arith.constant 0 : i32
    return %c0_i32, %c0_i32_0 : i32, i32
  }
  func.func @transform_10(%arg0: i32) -> (i32, i32) {
    %c0_i32 = arith.constant 0 : i32
    %c0_i32_0 = arith.constant 0 : i32
    %c0_i32_1 = arith.constant 0 : i32
    return %c0_i32, %c0_i32_0 : i32, i32
  }
  func.func @transform_11(%arg0: i32) -> (i32, i32) {
    %c0_i32 = arith.constant 0 : i32
    %c0_i32_0 = arith.constant 0 : i32
    %c0_i32_1 = arith.constant 0 : i32
    return %c0_i32, %c0_i32_0 : i32, i32
  }
  func.func @transform_12(%arg0: i32) -> (i32, i32) {
    %c0_i32 = arith.constant 0 : i32
    %c0_i32_0 = arith.constant 0 : i32
    %c0_i32_1 = arith.constant 0 : i32
    return %c0_i32, %c0_i32_0 : i32, i32
  }
  func.func @transform_13(%arg0: i32) -> (i32, i32) {
    %c0_i32 = arith.constant 0 : i32
    %c0_i32_0 = arith.constant 0 : i32
    return %arg0, %c0_i32 : i32, i32
  }
}

</mosaic_0001>

<bundles_post_ra>
// kernel: tpu_custom_call.1
= control target key start
LH: loop header
LB: loop body
LE: loop exit
PB: predicated region body
PF: predicated region fallthrough
CT: control target
= control target key end

     0   :  { %s6438_s0 = inlined_call_operand.vmem [shape: bf16[68,16,16], index: 0, kind: input, shape index: {}]   ;;  %s6439_s1 = inlined_call_operand.vmem [shape: bf16[80,32], index: 1, kind: input, shape index: {}]   ;;  %s6440_s2 = inlined_call_operand.vmem [shape: f32[1,32], index: 2, kind: input, shape index: {}]   ;;  %s6441_s3 = inlined_call_operand.vmem [shape: f32[1,32], index: 3, kind: input, shape index: {}]   ;;  %s6442_s4 = inlined_call_operand.vmem [shape: f32[1,32], index: 4, kind: input, shape index: {}]   ;;  %s6443_s5 = inlined_call_operand.vmem [shape: bf16[160,32], index: 5, kind: input, shape index: {}]   ;;  %s6444_s6 = inlined_call_operand.vmem [shape: f32[1,32], index: 6, kind: input, shape index: {}]   ;;  %s6445_s7 = inlined_call_operand.vmem [shape: f32[1,32], index: 7, kind: input, shape index: {}]   ;;  %s6446_s8 = inlined_call_operand.vmem [shape: f32[1,32], index: 8, kind: input, shape index: {}]   ;;  %s6447_s9 = inlined_call_operand.vmem [shape: bf16[32,256], index: 9, kind: input, shape index: {}]   ;;  %s6448_s10 = inlined_call_operand.vmem [shape: f32[1,256], index: 10, kind: input, shape index: {}]   ;;  %s6449_s11 = inlined_call_operand.vmem [shape: bf16[256,128], index: 11, kind: input, shape index: {}]   ;;  %s6450_s12 = inlined_call_operand.vmem [shape: f32[1,128], index: 12, kind: input, shape index: {}]   ;;  %s6451_s13 = inlined_call_operand.hbm [shape: f32[16,128], index: 13, kind: output, shape index: {}]  }
   0x1   :  { %6463 = sst [smem:[#allocation10_spill]] %s6438_s0 }
   0x2   :  { %6464 = sst [smem:[#allocation11_spill]] %s6439_s1 }
   0x3   :  { %18 = vsyncpa [#allocation5], 0 }
   0x4   :  { %20 = vsyncpa [#allocation5 + $0x1], 0  ;;  %s5207_s25 = smov 0   ;;  %s5209_s26 = smov 0  }
   0x5   :  { %s5211_s27 = smov 0   ;;  %s5213_s28 = smov 0  }
   0x6 LB: > { %6465 = sst [smem:[#allocation7_spill]] %s5111_s27  ;;  %s6452_s29 = sadd.s32 4294967295, %s5115_s28   ;;  %s5115_s28 = sphi %s5213_s28, %s6484_s28   ;;  %s5111_s27 = sphi %s5211_s27, %s6481_s27   ;;  %s5107_s26 = sphi %s5209_s26, %s6483_s26   ;;  %s5103_s25 = sphi %s5207_s25, %s6482_s25  }
   0x7   : > { %s3596_s30 = sadd.s32 4294967294, %s5115_s28   ;;  %s5230_s14 = sadd.s32 1, %s5115_s28  }
   0x8   : > { %s33_s15 = sadd.s32 1, %s5111_s27  ;;  %s30_s16 = ssub.s32 %s5115_s28, %s5230_s14 }
   0x9   : > { %p40_p0 = scmp.ne.s32.totalorder %s5111_s27, %s5107_s26  ;;  %p31_p1 = scmp.eq.s32.totalorder %s30_s16, 0 }
   0xa   : > { %p41_p2 = scmp.eq.s32.totalorder %s5115_s28, 0  ;;  %p322_p3 = scmp.eq.s32.totalorder %s6452_s29, 1 }
   0xb   : > { %p327_p4 = scmp.ne.s32.totalorder %s5107_s26, %s5103_s25  ;;  %p328_p7 = scmp.eq.s32.totalorder %s3596_s30, 1 }
   0xc   : > { %s5243_s17 = scalar_select %p31_p1, %s5111_s27, %s33_s15  }
   0xd   : > { %p42_p5 = por %p41_p2, %p40_p0  ;;  %p5245_p6 = por %p322_p3, %p40_p0 }
   0xe   : > { %6466 = sst [smem:[#allocation8_spill]] %s5243_s17  ;;  %p5249_p8 = por %p328_p7, %p327_p4 }
   0xf   : > { %p3598_p9 = scmp.ge.s32.totalorder %s5115_s28, 2 }
  0x11   : > { %380 = sbr.rel (%p3598_p9) target bundleno = 100 (0x64), region = 64 }
  0x16   : > { %383 = sbr.rel (!%p42_p5) target bundleno = 100 (0x64), region = 68  ;;  %s385_s20 = sand.u32 (%p42_p5), 1, %s5111_s27  }
  0x17   : > { %s3599_s21 = sshll.u32 (%p42_p5), %s5115_s28, 2  ;;  %s4961_s22 = smul.u32 (%p42_p5), 272, %s385_s20 }
  0x18   : > { %s6469_s0 = sld [smem:[#allocation10_spill]] (%p42_p5) }
  0x19   : > { %s5266_s30 = scalar_lea.vmem (%p42_p5), [#allocation3], %s4961_s22 }
  0x1e   : > { %s5261_s15 = scalar_lea.vmem %s6469_s0, %s3599_s21 }
  0x1f   : > { %v406_v0 = vld [vmem:[%s5261_s15] sm:$0xf]  ;;  %v408_v1 = vld [vmem:[%s5261_s15 + $0x8] sm:$0xf]  ;;  %v410_v2 = vld [vmem:[%s5261_s15 + $0x10] sm:$0xf] }
  0x20   : > { %407 = vst [vmem:[%s5266_s30] sm:$0xf] %v406_v0  ;;  %v412_v3 = vld [vmem:[%s5261_s15 + $0x18] sm:$0xf]  ;;  %v414_v4 = vld [vmem:[%s5261_s15 + $0x20] sm:$0xf] }
  0x21   : > { %409 = vst [vmem:[%s5266_s30 + $0x4] sm:$0xf] %v408_v1  ;;  %v416_v5 = vld [vmem:[%s5261_s15 + $0x28] sm:$0xf]  ;;  %v418_v6 = vld [vmem:[%s5261_s15 + $0x30] sm:$0xf] }
  0x22   : > { %411 = vst [vmem:[%s5266_s30 + $0x8] sm:$0xf] %v410_v2  ;;  %v420_v7 = vld [vmem:[%s5261_s15 + $0x38] sm:$0xf]  ;;  %v422_v8 = vld [vmem:[%s5261_s15 + $0x40] sm:$0xf] }
  0x23   : > { %413 = vst [vmem:[%s5266_s30 + $0xc] sm:$0xf] %v412_v3  ;;  %v424_v9 = vld [vmem:[%s5261_s15 + $0x48] sm:$0xf]  ;;  %v426_v10 = vld [vmem:[%s5261_s15 + $0x50] sm:$0xf] }
  0x24   : > { %415 = vst [vmem:[%s5266_s30 + $0x10] sm:$0xf] %v414_v4  ;;  %v428_v11 = vld [vmem:[%s5261_s15 + $0x58] sm:$0xf]  ;;  %v430_v12 = vld [vmem:[%s5261_s15 + $0x60] sm:$0xf] }
  0x25   : > { %417 = vst [vmem:[%s5266_s30 + $0x14] sm:$0xf] %v416_v5  ;;  %v432_v13 = vld [vmem:[%s5261_s15 + $0x68] sm:$0xf]  ;;  %v434_v14 = vld [vmem:[%s5261_s15 + $0x70] sm:$0xf] }
  0x26   : > { %419 = vst [vmem:[%s5266_s30 + $0x18] sm:$0xf] %v418_v6  ;;  %v436_v15 = vld [vmem:[%s5261_s15 + $0x78] sm:$0xf]  ;;  %v438_v16 = vld [vmem:[%s5261_s15 + $0x80] sm:$0xf] }
  0x27   : > { %421 = vst [vmem:[%s5266_s30 + $0x1c] sm:$0xf] %v420_v7  ;;  %v440_v17 = vld [vmem:[%s5261_s15 + $0x88] sm:$0xf]  ;;  %v442_v18 = vld [vmem:[%s5261_s15 + $0x90] sm:$0xf] }
  0x28   : > { %423 = vst [vmem:[%s5266_s30 + $0x20] sm:$0xf] %v422_v8  ;;  %v444_v19 = vld [vmem:[%s5261_s15 + $0x98] sm:$0xf]  ;;  %v446_v20 = vld [vmem:[%s5261_s15 + $0xa0] sm:$0xf] }
  0x29   : > { %425 = vst [vmem:[%s5266_s30 + $0x24] sm:$0xf] %v424_v9  ;;  %v448_v21 = vld [vmem:[%s5261_s15 + $0xa8] sm:$0xf]  ;;  %v450_v22 = vld [vmem:[%s5261_s15 + $0xb0] sm:$0xf] }
  0x2a   : > { %427 = vst [vmem:[%s5266_s30 + $0x28] sm:$0xf] %v426_v10  ;;  %v452_v23 = vld [vmem:[%s5261_s15 + $0xb8] sm:$0xf]  ;;  %v454_v24 = vld [vmem:[%s5261_s15 + $0xc0] sm:$0xf] }
  0x2b   : > { %429 = vst [vmem:[%s5266_s30 + $0x2c] sm:$0xf] %v428_v11  ;;  %v456_v25 = vld [vmem:[%s5261_s15 + $0xc8] sm:$0xf]  ;;  %v458_v26 = vld [vmem:[%s5261_s15 + $0xd0] sm:$0xf] }
  0x2c   : > { %431 = vst [vmem:[%s5266_s30 + $0x30] sm:$0xf] %v430_v12  ;;  %v460_v27 = vld [vmem:[%s5261_s15 + $0xd8] sm:$0xf]  ;;  %v462_v28 = vld [vmem:[%s5261_s15 + $0xe0] sm:$0xf] }
  0x2d   : > { %433 = vst [vmem:[%s5266_s30 + $0x34] sm:$0xf] %v432_v13  ;;  %v464_v29 = vld [vmem:[%s5261_s15 + $0xe8] sm:$0xf]  ;;  %v466_v30 = vld [vmem:[%s5261_s15 + $0xf0] sm:$0xf] }
  0x2e   : > { %435 = vst [vmem:[%s5266_s30 + $0x38] sm:$0xf] %v434_v14  ;;  %v468_v31 = vld [vmem:[%s5261_s15 + $0xf8] sm:$0xf]  ;;  %v470_v32 = vld [vmem:[%s5261_s15 + $0x100] sm:$0xf] }
  0x2f   : > { %437 = vst [vmem:[%s5266_s30 + $0x3c] sm:$0xf] %v436_v15  ;;  %v472_v33 = vld [vmem:[%s5261_s15 + $0x108] sm:$0xf]  ;;  %v474_v34 = vld [vmem:[%s5261_s15 + $0x110] sm:$0xf] }
  0x30   : > { %439 = vst [vmem:[%s5266_s30 + $0x40] sm:$0xf] %v438_v16  ;;  %v476_v35 = vld [vmem:[%s5261_s15 + $0x118] sm:$0xf]  ;;  %v478_v36 = vld [vmem:[%s5261_s15 + $0x120] sm:$0xf] }
  0x31   : > { %441 = vst [vmem:[%s5266_s30 + $0x44] sm:$0xf] %v440_v17  ;;  %v480_v37 = vld [vmem:[%s5261_s15 + $0x128] sm:$0xf]  ;;  %v482_v38 = vld [vmem:[%s5261_s15 + $0x130] sm:$0xf] }
  0x32   : > { %443 = vst [vmem:[%s5266_s30 + $0x48] sm:$0xf] %v442_v18  ;;  %v484_v39 = vld [vmem:[%s5261_s15 + $0x138] sm:$0xf]  ;;  %v486_v40 = vld [vmem:[%s5261_s15 + $0x140] sm:$0xf] }
  0x33   : > { %445 = vst [vmem:[%s5266_s30 + $0x4c] sm:$0xf] %v444_v19  ;;  %v488_v41 = vld [vmem:[%s5261_s15 + $0x148] sm:$0xf]  ;;  %v490_v42 = vld [vmem:[%s5261_s15 + $0x150] sm:$0xf] }
  0x34   : > { %447 = vst [vmem:[%s5266_s30 + $0x50] sm:$0xf] %v446_v20  ;;  %v492_v43 = vld [vmem:[%s5261_s15 + $0x158] sm:$0xf]  ;;  %v494_v44 = vld [vmem:[%s5261_s15 + $0x160] sm:$0xf] }
  0x35   : > { %449 = vst [vmem:[%s5266_s30 + $0x54] sm:$0xf] %v448_v21  ;;  %v496_v45 = vld [vmem:[%s5261_s15 + $0x168] sm:$0xf]  ;;  %v498_v46 = vld [vmem:[%s5261_s15 + $0x170] sm:$0xf] }
  0x36   : > { %451 = vst [vmem:[%s5266_s30 + $0x58] sm:$0xf] %v450_v22  ;;  %v500_v47 = vld [vmem:[%s5261_s15 + $0x178] sm:$0xf]  ;;  %v502_v48 = vld [vmem:[%s5261_s15 + $0x180] sm:$0xf] }
  0x37   : > { %453 = vst [vmem:[%s5266_s30 + $0x5c] sm:$0xf] %v452_v23  ;;  %v504_v49 = vld [vmem:[%s5261_s15 + $0x188] sm:$0xf]  ;;  %v506_v50 = vld [vmem:[%s5261_s15 + $0x190] sm:$0xf] }
  0x38   : > { %455 = vst [vmem:[%s5266_s30 + $0x60] sm:$0xf] %v454_v24  ;;  %v508_v51 = vld [vmem:[%s5261_s15 + $0x198] sm:$0xf]  ;;  %v510_v52 = vld [vmem:[%s5261_s15 + $0x1a0] sm:$0xf] }
  0x39   : > { %457 = vst [vmem:[%s5266_s30 + $0x64] sm:$0xf] %v456_v25  ;;  %v512_v53 = vld [vmem:[%s5261_s15 + $0x1a8] sm:$0xf]  ;;  %v514_v54 = vld [vmem:[%s5261_s15 + $0x1b0] sm:$0xf] }
  0x3a   : > { %459 = vst [vmem:[%s5266_s30 + $0x68] sm:$0xf] %v458_v26  ;;  %v516_v55 = vld [vmem:[%s5261_s15 + $0x1b8] sm:$0xf]  ;;  %v518_v56 = vld [vmem:[%s5261_s15 + $0x1c0] sm:$0xf] }
  0x3b   : > { %461 = vst [vmem:[%s5266_s30 + $0x6c] sm:$0xf] %v460_v27  ;;  %v520_v57 = vld [vmem:[%s5261_s15 + $0x1c8] sm:$0xf]  ;;  %v522_v58 = vld [vmem:[%s5261_s15 + $0x1d0] sm:$0xf] }
  0x3c   : > { %463 = vst [vmem:[%s5266_s30 + $0x70] sm:$0xf] %v462_v28  ;;  %v524_v59 = vld [vmem:[%s5261_s15 + $0x1d8] sm:$0xf]  ;;  %v526_v60 = vld [vmem:[%s5261_s15 + $0x1e0] sm:$0xf] }
  0x3d   : > { %465 = vst [vmem:[%s5266_s30 + $0x74] sm:$0xf] %v464_v29  ;;  %v528_v61 = vld [vmem:[%s5261_s15 + $0x1e8] sm:$0xf]  ;;  %v530_v62 = vld [vmem:[%s5261_s15 + $0x1f0] sm:$0xf] }
  0x3e   : > { %467 = vst [vmem:[%s5266_s30 + $0x78] sm:$0xf] %v466_v30  ;;  %v532_v63 = vld [vmem:[%s5261_s15 + $0x1f8] sm:$0xf]  ;;  %v534_v0 = vld [vmem:[%s5261_s15 + $0x200] sm:$0xf] }
  0x3f   : > { %469 = vst [vmem:[%s5266_s30 + $0x7c] sm:$0xf] %v468_v31  ;;  %v536_v1 = vld [vmem:[%s5261_s15 + $0x208] sm:$0xf]  ;;  %v538_v2 = vld [vmem:[%s5261_s15 + $0x210] sm:$0xf] }
  0x40   : > { %471 = vst [vmem:[%s5266_s30 + $0x80] sm:$0xf] %v470_v32  ;;  %v540_v3 = vld [vmem:[%s5261_s15 + $0x218] sm:$0xf] }
  0x41   : > { %473 = vst [vmem:[%s5266_s30 + $0x84] sm:$0xf] %v472_v33 }
  0x42   : > { %475 = vst [vmem:[%s5266_s30 + $0x88] sm:$0xf] %v474_v34 }
  0x43   : > { %477 = vst [vmem:[%s5266_s30 + $0x8c] sm:$0xf] %v476_v35 }
  0x44   : > { %479 = vst [vmem:[%s5266_s30 + $0x90] sm:$0xf] %v478_v36 }
  0x45   : > { %481 = vst [vmem:[%s5266_s30 + $0x94] sm:$0xf] %v480_v37 }
  0x46   : > { %483 = vst [vmem:[%s5266_s30 + $0x98] sm:$0xf] %v482_v38 }
  0x47   : > { %485 = vst [vmem:[%s5266_s30 + $0x9c] sm:$0xf] %v484_v39 }
  0x48   : > { %487 = vst [vmem:[%s5266_s30 + $0xa0] sm:$0xf] %v486_v40 }
  0x49   : > { %489 = vst [vmem:[%s5266_s30 + $0xa4] sm:$0xf] %v488_v41 }
  0x4a   : > { %491 = vst [vmem:[%s5266_s30 + $0xa8] sm:$0xf] %v490_v42 }
  0x4b   : > { %493 = vst [vmem:[%s5266_s30 + $0xac] sm:$0xf] %v492_v43 }
  0x4c   : > { %495 = vst [vmem:[%s5266_s30 + $0xb0] sm:$0xf] %v494_v44 }
  0x4d   : > { %497 = vst [vmem:[%s5266_s30 + $0xb4] sm:$0xf] %v496_v45 }
  0x4e   : > { %499 = vst [vmem:[%s5266_s30 + $0xb8] sm:$0xf] %v498_v46 }
  0x4f   : > { %501 = vst [vmem:[%s5266_s30 + $0xbc] sm:$0xf] %v500_v47 }
  0x50   : > { %503 = vst [vmem:[%s5266_s30 + $0xc0] sm:$0xf] %v502_v48 }
  0x51   : > { %505 = vst [vmem:[%s5266_s30 + $0xc4] sm:$0xf] %v504_v49 }
  0x52   : > { %507 = vst [vmem:[%s5266_s30 + $0xc8] sm:$0xf] %v506_v50 }
  0x53   : > { %509 = vst [vmem:[%s5266_s30 + $0xcc] sm:$0xf] %v508_v51 }
  0x54   : > { %511 = vst [vmem:[%s5266_s30 + $0xd0] sm:$0xf] %v510_v52 }
  0x55   : > { %513 = vst [vmem:[%s5266_s30 + $0xd4] sm:$0xf] %v512_v53 }
  0x56   : > { %515 = vst [vmem:[%s5266_s30 + $0xd8] sm:$0xf] %v514_v54 }
  0x57   : > { %517 = vst [vmem:[%s5266_s30 + $0xdc] sm:$0xf] %v516_v55 }
  0x58   : > { %519 = vst [vmem:[%s5266_s30 + $0xe0] sm:$0xf] %v518_v56 }
  0x59   : > { %521 = vst [vmem:[%s5266_s30 + $0xe4] sm:$0xf] %v520_v57 }
  0x5a   : > { %523 = vst [vmem:[%s5266_s30 + $0xe8] sm:$0xf] %v522_v58 }
  0x5b   : > { %525 = vst [vmem:[%s5266_s30 + $0xec] sm:$0xf] %v524_v59 }
  0x5c   : > { %527 = vst [vmem:[%s5266_s30 + $0xf0] sm:$0xf] %v526_v60 }
  0x5d   : > { %529 = vst [vmem:[%s5266_s30 + $0xf4] sm:$0xf] %v528_v61 }
  0x5e   : > { %531 = vst [vmem:[%s5266_s30 + $0xf8] sm:$0xf] %v530_v62 }
  0x5f   : > { %533 = vst [vmem:[%s5266_s30 + $0xfc] sm:$0xf] %v532_v63 }
  0x60   : > { %535 = vst [vmem:[%s5266_s30 + $0x100] sm:$0xf] %v534_v0 }
  0x61   : > { %537 = vst [vmem:[%s5266_s30 + $0x104] sm:$0xf] %v536_v1 }
  0x62   : > { %539 = vst [vmem:[%s5266_s30 + $0x108] sm:$0xf] %v538_v2 }
  0x63   : > { %541 = vst [vmem:[%s5266_s30 + $0x10c] sm:$0xf] %v540_v3 }
  0x64 PF: > { %p3600_p10 = scmp.ge.s32.totalorder %s5115_s28, 1  ;;  %p700_p11 = scmp.lt.s32.totalorder %s5115_s28, 3 }
  0x66   : > { %p701_p12 = pnand %p3600_p10, %p700_p11 }
  0x68   : > { %704 = sbr.rel (%p701_p12) target bundleno = 1260 (0x4ec), region = 109 }
  0x6d   : > { %s5404_s16 = sand.u32 1, %s5107_s26   ;;  %vm751_vm0 = vcmask 257024   ;;  %v5129_v4 = vmov 0   ;;  %s5416_s24 = smov 0  }
  0x6e   : > { %s4962_s20 = smul.u32 272, %s5404_s16  ;;  %s3601_s21 = sshll.u32 %s5404_s16, 3  ;;  %752 = vst.msk [vmem:[#allocation2] sm:$0xf] %vm751_vm0, %v5129_v4 }
  0x6f   : > { %753 = vst.msk [vmem:[#allocation2 + $0x4] sm:$0xf] %vm751_vm0, %v5129_v4  ;;  %s5414_s23 = scalar_lea.vmem [#allocation4], %s3601_s21 }
  0x70   : > { %755 = vst.msk [vmem:[#allocation2 + $0x108] sm:$0xf] %vm751_vm0, %v5129_v4  ;;  %s5412_s22 = scalar_lea.vmem [#allocation3], %s4962_s20 }
  0x71   : > { %756 = vst.msk [vmem:[#allocation2 + $0x10c] sm:$0xf] %vm751_vm0, %v5129_v4  ;;  %6470 = sst [smem:[#allocation9_spill]] %s5412_s22 }
  0x72 LB: >> { %s6471_s22 = sld [smem:[#allocation9_spill]]  ;;  %s6453_s15 = sshll.u32 %s5119_s24, 7  ;;  %vm1466_vm1 = vcmask 130048   ;;  %vm1515_vm2 = vcmask 261120   ;;  %vm1548_vm3 = vcmask 392192   ;;  %vm1581_vm4 = vcmask 523264   ;;  %s5119_s24 = sphi %s5416_s24, %s762_s24  }
  0x73   : >> { %s6458_s20 = smov 32   ;;  %s6456_s21 = smov 16   ;;  %vm1658_vm5 = vcmask 654336  }
  0x74   : >> { %s6460_s29 = smov 48   ;;  %s6472_s1 = sld [smem:[#allocation11_spill]] }
  0x75   : >> { %s6475_s17 = smov 32   ;;  %s6476_s27 = smov 48  }
  0x76   : >> { %s6477_s0 = sshll.u32 %s5119_s24, 7  ;;  %s762_s24 = sadd.s32 1, %s5119_s24  }
  0x77   : >> { %p759_p13 = scmp.ge.s32.totalorder %s762_s24, 2  }
  0x78   : >> { %s5425_s30 = scalar_lea.vmem %s6471_s22, %s6453_s15  ;;  %s6454_s15 = smov 64  }
  0x79   : >> { %v4773_v5 = vld [vmem:[%s5425_s30 + $0x48] sm:$0xff]  ;;  %v4811_v11 = vld [vmem:[%s5425_s30 + $0x70] sm:$0xff]  ;;  %v4808_v26 = vld [vmem:[%s5425_s30 + $0x58] sm:$0xff]  ;;  %s6474_s22 = smov 16  }
  0x7a   : >> { %v4756_v6 = vld [vmem:[%s5425_s30 + $0x44] sm:$0xff]  ;;  %1226 = vrot.lane.b32.xlu1 %v4773_v5, %s6458_s20  ;;  %v4790_v7 = vld [vmem:[%s5425_s30 + $0x4c] sm:$0xff]  ;;  %v4791_v25 = vld [vmem:[%s5425_s30 + $0x54] sm:$0xff] }
  0x7b   : >> { %1114 = vrot.lane.b32.xlu0 %v4756_v6, %s6456_s21  ;;  %1338 = vrot.lane.b32.xlu2 %v4790_v7, %s6460_s29  ;;  %v4777_v8 = vld [vmem:[%s5425_s30 + $0x68] sm:$0xff]  ;;  %v4807_v12 = vld [vmem:[%s5425_s30 + $0x50] sm:$0xff] }
  0x7c   : >> { %v4760_v9 = vld [vmem:[%s5425_s30 + $0x64] sm:$0xff]  ;;  %v4794_v10 = vld [vmem:[%s5425_s30 + $0x6c] sm:$0xff]  ;;  %v4795_v27 = vld [vmem:[%s5425_s30 + $0x74] sm:$0xff] }
  0x7d   : >> { %v4748_v13 = vld [vmem:[%s5425_s30 + $0x4] sm:$0xff]  ;;  %v4786_v17 = vld [vmem:[%s5425_s30 + $0x2c] sm:$0xff]  ;;  %v4812_v28 = vld [vmem:[%s5425_s30 + $0x78] sm:$0xff] }
  0x7e   : >> { %v4765_v14 = vld [vmem:[%s5425_s30 + $0x8] sm:$0xff]  ;;  %v4799_v19 = vld [vmem:[%s5425_s30 + $0x10] sm:$0xff]  ;;  %v4804_v35 = vld [vmem:[%s5425_s30 + $0x38] sm:$0xff] }
  0x7f   : >> { %v4752_v15 = vld [vmem:[%s5425_s30 + $0x24] sm:$0xff]  ;;  %v4782_v18 = vld [vmem:[%s5425_s30 + $0xc] sm:$0xff]  ;;  %v4783_v32 = vld [vmem:[%s5425_s30 + $0x14] sm:$0xff] }
  0x80   : >> { %v4769_v16 = vld [vmem:[%s5425_s30 + $0x28] sm:$0xff]  ;;  %v4803_v21 = vld [vmem:[%s5425_s30 + $0x30] sm:$0xff]  ;;  %v4800_v36 = vld [vmem:[%s5425_s30 + $0x18] sm:$0xff] }
  0x81   : >> { %v4757_v20 = vld [vmem:[%s5425_s30 + $0x4c] sm:$0xff]  ;;  %v4787_v34 = vld [vmem:[%s5425_s30 + $0x34] sm:$0xff]  ;;  %v4819_v38 = vld [vmem:[%s6472_s1 + $0x20] sm:$0xff] }
  0x82   : >> { %1234 = vrot.lane.b32.xlu1 %v4777_v8, %s6458_s20  ;;  %v4761_v22 = vld [vmem:[%s5425_s30 + $0x6c] sm:$0xff]  ;;  %v4758_v37 = vld [vmem:[%s5425_s30 + $0x54] sm:$0xff]  ;;  %4937 = vmatpush.bf16.msra.mxu2 %v4819_v38  ;;  %v4796_v45 = vld [vmem:[%s5425_s30 + $0x7c] sm:$0xff] }
  0x83   : >> { %1122 = vrot.lane.b32.xlu0 %v4760_v9, %s6456_s21  ;;  %1346 = vrot.lane.b32.xlu2 %v4794_v10, %s6460_s29  ;;  %v4778_v23 = vld [vmem:[%s5425_s30 + $0x70] sm:$0xff]  ;;  %v4818_v39 = vld [vmem:[%s6472_s1 + $0x18] sm:$0xff] }
  0x84   : >> { %v4774_v24 = vld [vmem:[%s5425_s30 + $0x50] sm:$0xff]  ;;  %4938 = vmatpush.bf16.msra.mxu3 %v4819_v38  ;;  %1694 = vmatpush.bf16.msra.mxu0 %v4819_v38  ;;  %v4775_v40 = vld [vmem:[%s5425_s30 + $0x58] sm:$0xff]  ;;  %v4816_v44 = vld [vmem:[%s6472_s1 + $0x8] sm:$0xff] }
  0x85   : >> { %v4753_v29 = vld [vmem:[%s5425_s30 + $0x2c] sm:$0xff]  ;;  %4936 = vmatpush.bf16.msra.mxu1 %v4819_v38  ;;  %v4762_v41 = vld [vmem:[%s5425_s30 + $0x74] sm:$0xff]  ;;  %v4792_v46 = vld [vmem:[%s5425_s30 + $0x5c] sm:$0xff] }
  0x86   : >> { %v4749_v30 = vld [vmem:[%s5425_s30 + $0xc] sm:$0xff]  ;;  %4940 = vmatpush.bf16.msra.mxu2 %v4818_v39  ;;  %v4779_v42 = vld [vmem:[%s5425_s30 + $0x78] sm:$0xff]  ;;  %v4809_v48 = vld [vmem:[%s5425_s30 + $0x60] sm:$0xff] }
  0x87   : >> { %v4766_v31 = vld [vmem:[%s5425_s30 + $0x10] sm:$0xff]  ;;  %v4815_v49 = vld [vmem:[%s6472_s1] sm:$0xff]  ;;  %v4771_v54 = vld [vmem:[%s5425_s30 + $0x38] sm:$0xff] }
  0x88   : >> { %v4770_v33 = vld [vmem:[%s5425_s30 + $0x30] sm:$0xff]  ;;  %4941 = vmatpush.bf16.msra.mxu3 %v4818_v39  ;;  %1695 = vmatpush.bf16.msra.mxu0 %v4818_v39  ;;  %v4813_v51 = vld [vmem:[%s5425_s30 + $0x80] sm:$0xff]  ;;  %v4767_v55 = vld [vmem:[%s5425_s30 + $0x18] sm:$0xff] }
  0x89   : >> { %4939 = vmatpush.bf16.msra.mxu1 %v4818_v39  ;;  %v4817_v43 = vld [vmem:[%s6472_s1 + $0x10] sm:$0xff]  ;;  %v4784_v57 = vld [vmem:[%s5425_s30 + $0x1c] sm:$0xff] }
  0x8a   : >> { %1458 = vrot.lane.b32.xlu1 %v4811_v11, %s6454_s15  ;;  %4943 = vmatpush.bf16.msra.mxu2 %v4817_v43  ;;  %v4750_v50 = vld [vmem:[%s5425_s30 + $0x14] sm:$0xff]  ;;  %v4801_v60 = vld [vmem:[%s5425_s30 + $0x20] sm:$0xff] }
  0x8b   : >> { %1450 = vrot.lane.b32.xlu0 %v4807_v12, %s6454_s15  ;;  %1098 = vrot.lane.b32.xlu2 %v4748_v13, %s6456_s21  ;;  %v4754_v53 = vld [vmem:[%s5425_s30 + $0x34] sm:$0xff]  ;;  %v4788_v61 = vld [vmem:[%s5425_s30 + $0x3c] sm:$0xff] }
  0x8c   : >> { %4944 = vmatpush.bf16.msra.mxu3 %v4817_v43  ;;  %1696 = vmatpush.bf16.msra.mxu0 %v4817_v43  ;;  %v4805_v63 = vld [vmem:[%s5425_s30 + $0x40] sm:$0xff] }
  0x8d   : >> { %4942 = vmatpush.bf16.msra.mxu1 %v4817_v43  ;;  %v4739_v0 = vld [vmem:[%s5425_s30 + $0x40] sm:$0xff] }
  0x8e   : >> { %4946 = vmatpush.bf16.msra.mxu2 %v4816_v44  ;;  %v4743_v1 = vld [vmem:[%s5425_s30 + $0x60] sm:$0xff] }
  0x8f   : >> { %v4763_v6 = vld [vmem:[%s5425_s30 + $0x7c] sm:$0xff] }
  0x90   : >> { %4947 = vmatpush.bf16.msra.mxu3 %v4816_v44  ;;  %1697 = vmatpush.bf16.msra.mxu0 %v4816_v44  ;;  %v4759_v7 = vld [vmem:[%s5425_s30 + $0x5c] sm:$0xff] }
  0x91   : >> { %4945 = vmatpush.bf16.msra.mxu1 %v4816_v44  ;;  %v4776_v11 = vld [vmem:[%s5425_s30 + $0x60] sm:$0xff] }
  0x92   : >> { %1210 = vrot.lane.b32.xlu1 %v4765_v14, %s6458_s20  ;;  %4949 = vmatpush.bf16.msra.mxu2 %v4815_v49 }
  0x93   : >> { %1106 = vrot.lane.b32.xlu0 %v4752_v15, %s6456_s21  ;;  %1218 = vrot.lane.b32.xlu2 %v4769_v16, %s6458_s20 }
  0x94   : >> { %4950 = vmatpush.bf16.msra.mxu3 %v4815_v49  ;;  %1698 = vmatpush.bf16.msra.mxu0 %v4815_v49 }
  0x95   : >> { %4948 = vmatpush.bf16.msra.mxu1 %v4815_v49  ;;  %v4802_v49 = vld [vmem:[%s5425_s30 + $0x28] sm:$0xff] }
  0x9a   : >> { %1330 = vrot.lane.b32.xlu1 %v4786_v17, %s6460_s29 }
  0x9b   : >> { %1322 = vrot.lane.b32.xlu0 %v4782_v18, %s6460_s29  ;;  %1434 = vrot.lane.b32.xlu2 %v4799_v19, %s6454_s15  ;;  %v4793_v18 = vld [vmem:[%s5425_s30 + $0x64] sm:$0xff] }
  0x9c   : >> { %v4780_v19 = vld [vmem:[%s5425_s30 + $0x80] sm:$0xff] }
  0xa2   : >> { %1116 = vrot.lane.b32.xlu1 %v4757_v20, %s6456_s21 }
  0xa3   : >> { %1442 = vrot.lane.b32.xlu0 %v4803_v21, %s6454_s15  ;;  %1124 = vrot.lane.b32.xlu2 %v4761_v22, %s6456_s21  ;;  %v4797_v21 = vld [vmem:[%s5425_s30 + $0x84] sm:$0xff] }
  0xaa   : >> { %1236 = vrot.lane.b32.xlu1 %v4778_v23, %s6458_s20 }
  0xab   : >> { %1228 = vrot.lane.b32.xlu0 %v4774_v24, %s6458_s20  ;;  %1340 = vrot.lane.b32.xlu2 %v4791_v25, %s6460_s29  ;;  %v4731_v24 = vld [vmem:[%s5425_s30] sm:$0xff]  ;;  %v4814_v25 = vld [vmem:[%s5425_s30 + $0x88] sm:$0xff] }
  0xb2   : >> { %1452 = vrot.lane.b32.xlu1 %v4808_v26, %s6454_s15  ;;  %v4810_v26 = vld [vmem:[%s5425_s30 + $0x68] sm:$0xff] }
  0xb3   : >> { %1348 = vrot.lane.b32.xlu0 %v4795_v27, %s6460_s29  ;;  %1460 = vrot.lane.b32.xlu2 %v4812_v28, %s6454_s15  ;;  %s5684_s15 = scalar_lea.vmem [#allocation2], %s6477_s0 }
  0xba   : >> { %1108 = vrot.lane.b32.xlu1 %v4753_v29, %s6456_s21  ;;  %v4751_v29 = vld [vmem:[%s5425_s30 + $0x1c] sm:$0xff] }
  0xbb   : >> { %1100 = vrot.lane.b32.xlu0 %v4749_v30, %s6456_s21  ;;  %1212 = vrot.lane.b32.xlu2 %v4766_v31, %s6458_s20  ;;  %s6473_s21 = smov 64   ;;  %v4735_v31 = vld [vmem:[%s5425_s30 + $0x20] sm:$0xff] }
  0xc2   : >> { %1324 = vrot.lane.b32.xlu1 %v4783_v32, %s6460_s29 }
  0xc3   : >> { %1220 = vrot.lane.b32.xlu0 %v4770_v33, %s6458_s20  ;;  %1332 = vrot.lane.b32.xlu2 %v4787_v34, %s6460_s29 }
  0xca   : >> { %1444 = vrot.lane.b32.xlu1 %v4804_v35, %s6473_s21 }
  0xcb   : >> { %1436 = vrot.lane.b32.xlu0 %v4800_v36, %s6473_s21  ;;  %1118 = vrot.lane.b32.xlu2 %v4758_v37, %s6474_s22  ;;  %v4768_v36 = vld [vmem:[%s5425_s30 + $0x20] sm:$0xff] }
  0xcc   : >> { %v4755_v37 = vld [vmem:[%s5425_s30 + $0x3c] sm:$0xff] }
  0xd2   : >> { %1230 = vrot.lane.b32.xlu1 %v4775_v40, %s6475_s17  ;;  %v4772_v40 = vld [vmem:[%s5425_s30 + $0x40] sm:$0xff] }
  0xd3   : >> { %1126 = vrot.lane.b32.xlu0 %v4762_v41, %s6474_s22  ;;  %1238 = vrot.lane.b32.xlu2 %v4779_v42, %s6475_s17 }
  0xd5   : >> { %v1339_v47 = vpop.permute.xlu2 %1338 }
  0xda   : >> { %1350 = vrot.lane.b32.xlu1 %v4796_v45, %s6476_s27 }
  0xdb   : >> { %1342 = vrot.lane.b32.xlu0 %v4792_v46, %s6476_s27  ;;  %1454 = vrot.lane.b32.xlu2 %v4809_v48, %s6473_s21  ;;  %v4789_v46 = vld [vmem:[%s5425_s30 + $0x44] sm:$0xff] }
  0xdd   : >> { %v1347_v52 = vpop.permute.xlu2 %1346 }
  0xe2   : >> { %1102 = vrot.lane.b32.xlu1 %v4750_v50, %s6474_s22  ;;  %v4740_v50 = vld [vmem:[%s5425_s30 + $0x48] sm:$0xff] }
  0xe3   : >> { %1462 = vrot.lane.b32.xlu0 %v4813_v51, %s6473_s21  ;;  %1110 = vrot.lane.b32.xlu2 %v4754_v53, %s6474_s22  ;;  %v4744_v53 = vld [vmem:[%s5425_s30 + $0x68] sm:$0xff] }
  0xe5   : >> { %v1099_v56 = vpop.permute.xlu2 %1098 }
  0xe6   : >> { %v1469_v28 = vsel %vm1466_vm1, %v4731_v24, %v1099_v56  ;;  %v4741_v24 = vld [vmem:[%s5425_s30 + $0x50] sm:$0xff] }
  0xea   : >> { %1222 = vrot.lane.b32.xlu1 %v4771_v54, %s6475_s17 }
  0xeb   : >> { %1214 = vrot.lane.b32.xlu0 %v4767_v55, %s6475_s17  ;;  %1326 = vrot.lane.b32.xlu2 %v4784_v57, %s6476_s27  ;;  %v4806_v55 = vld [vmem:[%s5425_s30 + $0x48] sm:$0xff] }
  0xec   : >> { %v1227_v58 = vpop.permute.xlu1 %1226 }
  0xed   : >> { %v1115_v59 = vpop.permute.xlu0 %1114  ;;  %v5534_v62 = vpop.permute.xlu2 %1218 }
  0xee   : >> { %v1493_v4 = vsel %vm1466_vm1, %v4739_v0, %v1115_v59 }
  0xef   : >> { %v1533_v9 = vsel %vm1515_vm2, %v1493_v4, %v1227_v58 }
  0xf0   : >> { %v1566_v12 = vsel %vm1548_vm3, %v1533_v9, %v1339_v47  ;;  %v4785_v47 = vld [vmem:[%s5425_s30 + $0x24] sm:$0xff] }
  0xf2   : >> { %1438 = vrot.lane.b32.xlu1 %v4801_v60, %s6473_s21 }
  0xf3   : >> { %1334 = vrot.lane.b32.xlu0 %v4788_v61, %s6476_s27  ;;  %1446 = vrot.lane.b32.xlu2 %v4805_v63, %s6473_s21 }
  0xf4   : >> { %v1235_v2 = vpop.permute.xlu1 %1234 }
  0xf5   : >> { %v1123_v3 = vpop.permute.xlu0 %1122  ;;  %v1435_v8 = vpop.permute.xlu2 %1434 }
  0xf6   : >> { %v1505_v5 = vsel %vm1466_vm1, %v4743_v1, %v1123_v3 }
  0xf7   : >> { %v1541_v10 = vsel %vm1515_vm2, %v1505_v5, %v1235_v2 }
  0xf8   : >> { %v1574_v13 = vsel %vm1548_vm3, %v1541_v10, %v1347_v52 }
  0xfa   : >> { %1128 = vrot.lane.b32.xlu1 %v4763_v6, %s6474_s22  ;;  %v4736_v6 = vld [vmem:[%s5425_s30 + $0x28] sm:$0xff] }
  0xfb   : >> { %1120 = vrot.lane.b32.xlu0 %v4759_v7, %s6474_s22  ;;  %1232 = vrot.lane.b32.xlu2 %v4776_v11, %s6475_s17  ;;  %v4732_v7 = vld [vmem:[%s5425_s30 + $0x8] sm:$0xff] }
  0xfc   : >> { %v1459_v14 = vpop.permute.xlu1 %1458 }
  0xfd   : >> { %v1451_v15 = vpop.permute.xlu0 %1450  ;;  %v1607_v17 = vsel %vm1581_vm4, %v1574_v13, %v1459_v14  ;;  %v1125_v20 = vpop.permute.xlu2 %1124 }
  0xfe   : >> { %v1599_v16 = vsel %vm1581_vm4, %v1566_v12, %v1451_v15  ;;  %4092 = vmatmul.msk.bf16.vlgmr.msra.gmra.mxu3 %vm1658_vm5, %v1607_v17  ;;  %v1508_v57 = vsel %vm1466_vm1, %v4744_v53, %v1125_v20 }
  0xff   : >> { %4088 = vmatmul.msk.bf16.vlgmr.msra.gmra.mxu2 %vm1658_vm5, %v1599_v16 }
 0x102   : >> { %1344 = vrot.lane.b32.xlu1 %v4793_v18, %s6476_s27 }
 0x103   : >> { %1240 = vrot.lane.b32.xlu0 %v4780_v19, %s6475_s17  ;;  %1352 = vrot.lane.b32.xlu2 %v4797_v21, %s6476_s27 }
 0x104   : >> { %v1211_v22 = vpop.permute.xlu1 %1210 }
 0x105   : >> { %v1107_v23 = vpop.permute.xlu0 %1106  ;;  %v1341_v27 = vpop.permute.xlu2 %1340  ;;  %v1517_v30 = vsel %vm1515_vm2, %v1469_v28, %v1211_v22 }
 0x106   : >> { %v1481_v39 = vsel %vm1466_vm1, %v4735_v31, %v1107_v23 }
 0x107   : >> { %v1525_v41 = vsel %vm1515_vm2, %v1481_v39, %v5534_v62 }
 0x10a   : >> { %1464 = vrot.lane.b32.xlu1 %v4814_v25, %s6473_s21 }
 0x10b   : >> { %1456 = vrot.lane.b32.xlu0 %v4810_v26, %s6473_s21  ;;  %1104 = vrot.lane.b32.xlu2 %v4751_v29, %s6474_s22 }
 0x10c   : >> { %v1331_v32 = vpop.permute.xlu1 %1330 }
 0x10d   : >> { %v1323_v33 = vpop.permute.xlu0 %1322  ;;  %v1461_v38 = vpop.permute.xlu2 %1460  ;;  %v1558_v42 = vsel %vm1548_vm3, %v1525_v41, %v1331_v32 }
 0x10e   : >> { %v1550_v34 = vsel %vm1548_vm3, %v1517_v30, %v1323_v33 }
 0x10f   : >> { %v1583_v35 = vsel %vm1581_vm4, %v1550_v34, %v1435_v8 }
 0x110   : >> { %4080 = vmatmul.msk.bf16.vlgmr.msra.gmra.mxu0 %vm1658_vm5, %v1583_v35 }
 0x112   : >> { %1216 = vrot.lane.b32.xlu1 %v4768_v36, %s6475_s17 }
 0x113   : >> { %1112 = vrot.lane.b32.xlu0 %v4755_v37, %s6474_s22  ;;  %1224 = vrot.lane.b32.xlu2 %v4772_v40, %s6475_s17  ;;  %v4733_v40 = vld [vmem:[%s5425_s30 + $0x10] sm:$0xff] }
 0x114   : >> { %v1117_v43 = vpop.permute.xlu1 %1116 }
 0x115   : >> { %v1443_v44 = vpop.permute.xlu0 %1442  ;;  %v1213_v48 = vpop.permute.xlu2 %1212  ;;  %v1496_v54 = vsel %vm1466_vm1, %v4740_v50, %v1117_v43  ;;  %v4737_v43 = vld [vmem:[%s5425_s30 + $0x30] sm:$0xff] }
 0x116   : >> { %v1591_v45 = vsel %vm1581_vm4, %v1558_v42, %v1443_v44 }
 0x117   : >> { %4084 = vmatmul.msk.bf16.vlgmr.msra.gmra.mxu1 %vm1658_vm5, %v1591_v45 }
 0x11a   : >> { %1336 = vrot.lane.b32.xlu1 %v4789_v46, %s6476_s27 }
 0x11b   : >> { %1328 = vrot.lane.b32.xlu0 %v4785_v47, %s6476_s27  ;;  %1440 = vrot.lane.b32.xlu2 %v4802_v49, %s6473_s21 }
 0x11c   : >> { %v1237_v51 = vpop.permute.xlu1 %1236 }
 0x11d   : >> { %v1229_v52 = vpop.permute.xlu0 %1228  ;;  %v1333_v56 = vpop.permute.xlu2 %1332  ;;  %v1543_v59 = vsel %vm1515_vm2, %v1508_v57, %v1237_v51 }
 0x11e   : >> { %v1535_v58 = vsel %vm1515_vm2, %v1496_v54, %v1229_v52 }
 0x11f   : >> { %v1568_v60 = vsel %vm1548_vm3, %v1535_v58, %v1341_v27  ;;  %v4745_v27 = vld [vmem:[%s5425_s30 + $0x70] sm:$0xff]  ;;  %v4746_v58 = vld [vmem:[%s5425_s30 + $0x78] sm:$0xff] }
 0x123   : >> { %1448 = vrot.lane.b32.xlu0 %v4806_v55, %s6473_s21 }
 0x124   : >> { %v1453_v61 = vpop.permute.xlu1 %1452 }
 0x125   : >> { %v1349_v62 = vpop.permute.xlu0 %1348  ;;  %v1601_v0 = vsel %vm1581_vm4, %v1568_v60, %v1453_v61  ;;  %v1119_v2 = vpop.permute.xlu2 %1118 }
 0x126   : >> { %v1576_v63 = vsel %vm1548_vm3, %v1543_v59, %v1349_v62  ;;  %4089 = vmatmul.msk.bf16.gmra.mxu2 %vm1658_vm5, %v1601_v0  ;;  %v1499_v25 = vsel %vm1466_vm1, %v4741_v24, %v1119_v2  ;;  %v4742_v59 = vld [vmem:[%s5425_s30 + $0x58] sm:$0xff] }
 0x127   : >> { %v1609_v1 = vsel %vm1581_vm4, %v1576_v63, %v1461_v38 }
 0x128   : >> { %4093 = vmatmul.msk.bf16.gmra.mxu3 %vm1658_vm5, %v1609_v1 }
 0x12c   : >> { %v1109_v3 = vpop.permute.xlu1 %1108 }
 0x12d   : >> { %v1101_v4 = vpop.permute.xlu0 %1100  ;;  %v1239_v5 = vpop.permute.xlu2 %1238  ;;  %v1484_v10 = vsel %vm1466_vm1, %v4736_v6, %v1109_v3 }
 0x12e   : >> { %v1472_v11 = vsel %vm1466_vm1, %v4732_v7, %v1101_v4 }
 0x12f   : >> { %v1519_v14 = vsel %vm1515_vm2, %v1472_v11, %v1213_v48 }
 0x134   : >> { %v1325_v8 = vpop.permute.xlu1 %1324 }
 0x135   : >> { %v1221_v9 = vpop.permute.xlu0 %1220  ;;  %v1455_v13 = vpop.permute.xlu2 %1454  ;;  %v1552_v15 = vsel %vm1548_vm3, %v1519_v14, %v1325_v8  ;;  %v5666_v14 = vld [vmem:[%s6441_s3] ss:$0 sm:$0xff] }
 0x136   : >> { %v1527_v12 = vsel %vm1515_vm2, %v1484_v10, %v1221_v9  ;;  %v5660_v9 = vld [vmem:[%s6440_s2] ss:$0 sm:$0xff] }
 0x137   : >> { %v1560_v16 = vsel %vm1548_vm3, %v1527_v12, %v1333_v56 }
 0x13c   : >> { %v1445_v17 = vpop.permute.xlu1 %1444 }
 0x13d   : >> { %v1437_v18 = vpop.permute.xlu0 %1436  ;;  %v1593_v20 = vsel %vm1581_vm4, %v1560_v16, %v1445_v17  ;;  %v1111_v21 = vpop.permute.xlu2 %1110  ;;  %v5672_v17 = vld [vmem:[%s6442_s4] ss:$0 sm:$0xff] }
 0x13e   : >> { %v1585_v19 = vsel %vm1581_vm4, %v1552_v15, %v1437_v18  ;;  %4085 = vmatmul.msk.bf16.gmra.mxu1 %vm1658_vm5, %v1593_v20  ;;  %v1487_v45 = vsel %vm1466_vm1, %v4737_v43, %v1111_v21  ;;  %v4734_v20 = vld [vmem:[%s5425_s30 + $0x18] sm:$0xff] }
 0x13f   : >> { %4081 = vmatmul.msk.bf16.gmra.mxu0 %vm1658_vm5, %v1585_v19 }
 0x144   : >> { %v1231_v22 = vpop.permute.xlu1 %1230 }
 0x145   : >> { %v1127_v23 = vpop.permute.xlu0 %1126  ;;  %v1537_v26 = vsel %vm1515_vm2, %v1499_v25, %v1231_v22  ;;  %v1327_v31 = vpop.permute.xlu2 %1326 }
 0x146   : >> { %v1511_v33 = vsel %vm1466_vm1, %v4745_v27, %v1127_v23 }
 0x147   : >> { %v1545_v34 = vsel %vm1515_vm2, %v1511_v33, %v1239_v5 }
 0x14c   : >> { %v1351_v28 = vpop.permute.xlu1 %1350 }
 0x14d   : >> { %v1343_v29 = vpop.permute.xlu0 %1342  ;;  %v1578_v35 = vsel %vm1548_vm3, %v1545_v34, %v1351_v28  ;;  %v1447_v39 = vpop.permute.xlu2 %1446 }
 0x14e   : >> { %v1570_v30 = vsel %vm1548_vm3, %v1537_v26, %v1343_v29 }
 0x14f   : >> { %v1603_v32 = vsel %vm1581_vm4, %v1570_v30, %v1455_v13 }
 0x150   : >> { %4090 = vmatmul.msk.bf16.gmra.mxu2 %vm1658_vm5, %v1603_v32 }
 0x154   : >> { %v1103_v36 = vpop.permute.xlu1 %1102 }
 0x155   : >> { %v1463_v37 = vpop.permute.xlu0 %1462  ;;  %v1475_v44 = vsel %vm1466_vm1, %v4733_v40, %v1103_v36  ;;  %v1233_v47 = vpop.permute.xlu2 %1232 }
 0x156   : >> { %v1611_v38 = vsel %vm1581_vm4, %v1578_v35, %v1463_v37  ;;  %v4738_v35 = vld [vmem:[%s5425_s30 + $0x38] sm:$0xff]  ;;  %s5853_s30 = smov (%p759_p13), 0  }
 0x157   : >> { %4094 = vmatmul.msk.bf16.gmra.mxu3 %vm1658_vm5, %v1611_v38 }
 0x15c   : >> { %v1223_v41 = vpop.permute.xlu1 %1222 }
 0x15d   : >> { %v1215_v42 = vpop.permute.xlu0 %1214  ;;  %v1529_v48 = vsel %vm1515_vm2, %v1487_v45, %v1223_v41  ;;  %v1353_v55 = vpop.permute.xlu2 %1352 }
 0x15e   : >> { %v1521_v46 = vsel %vm1515_vm2, %v1475_v44, %v1215_v42 }
 0x15f   : >> { %v1554_v49 = vsel %vm1548_vm3, %v1521_v46, %v1327_v31 }
 0x164   : >> { %v1439_v50 = vpop.permute.xlu1 %1438 }
 0x165   : >> { %v1335_v51 = vpop.permute.xlu0 %1334  ;;  %v1587_v53 = vsel %vm1581_vm4, %v1554_v49, %v1439_v50  ;;  %v1105_v63 = vpop.permute.xlu2 %1104 }
 0x166   : >> { %v1562_v52 = vsel %vm1548_vm3, %v1529_v48, %v1335_v51  ;;  %4082 = vmatmul.msk.bf16.gmra.mxu0 %vm1658_vm5, %v1587_v53  ;;  %v1478_v26 = vsel %vm1466_vm1, %v4734_v20, %v1105_v63 }
 0x167   : >> { %v1595_v54 = vsel %vm1581_vm4, %v1562_v52, %v1447_v39 }
 0x168   : >> { %4086 = vmatmul.msk.bf16.gmra.mxu1 %vm1658_vm5, %v1595_v54 }
 0x16c   : >> { %v1129_v56 = vpop.permute.xlu1 %1128 }
 0x16d   : >> { %v1121_v57 = vpop.permute.xlu0 %1120  ;;  %v1514_v62 = vsel %vm1466_vm1, %v4746_v58, %v1129_v56  ;;  %v1225_v10 = vpop.permute.xlu2 %1224 }
 0x16e   : >> { %v1502_v0 = vsel %vm1466_vm1, %v4742_v59, %v1121_v57 }
 0x16f   : >> { %v1539_v2 = vsel %vm1515_vm2, %v1502_v0, %v1233_v47 }
 0x174   : >> { %v1345_v60 = vpop.permute.xlu1 %1344 }
 0x175   : >> { %v1241_v61 = vpop.permute.xlu0 %1240  ;;  %v1572_v3 = vsel %vm1548_vm3, %v1539_v2, %v1345_v60  ;;  %v1441_v33 = vpop.permute.xlu2 %1440 }
 0x176   : >> { %v1547_v1 = vsel %vm1515_vm2, %v1514_v62, %v1241_v61 }
 0x177   : >> { %v1580_v4 = vsel %vm1548_vm3, %v1547_v1, %v1353_v55 }
 0x17c   : >> { %v1465_v5 = vpop.permute.xlu1 %1464 }
 0x17d   : >> { %v1457_v6 = vpop.permute.xlu0 %1456  ;;  %v1613_v8 = vsel %vm1581_vm4, %v1580_v4, %v1465_v5 }
 0x17e   : >> { %v1605_v7 = vsel %vm1581_vm4, %v1572_v3, %v1457_v6  ;;  %4095 = vmatmul.msk.bf16.gmra.mxu3 %vm1658_vm5, %v1613_v8 }
 0x17f   : >> { %4091 = vmatmul.msk.bf16.gmra.mxu2 %vm1658_vm5, %v1605_v7 }
 0x181   : >> { %v1760_v12 = vpop.f32.mrf.mxu3 }
 0x182   : >> { %v1740_v11 = vpop.f32.mrf.mxu2  ;;  %v1761_v15 = vadd.f32 %v5660_v9, %v1760_v12 }
 0x183   : >> { %v1741_v13 = vadd.f32 %v5660_v9, %v1740_v11 }
 0x184   : >> { %v1804_v18 = vmax.f32 %v1761_v15, 0.0  ;;  %v1217_v23 = vpop.permute.xlu1 %1216 }
 0x185   : >> { %v1796_v16 = vmax.f32 %v1741_v13, 0.0  ;;  %v1113_v19 = vpop.permute.xlu0 %1112  ;;  %v1523_v34 = vsel %vm1515_vm2, %v1478_v26, %v1217_v23 }
 0x186   : >> { %v1840_v22 = vmul.f32 %v5666_v14, %v1804_v18  ;;  %v1490_v45 = vsel %vm1466_vm1, %v4738_v35, %v1113_v19 }
 0x187   : >> { %v1832_v21 = vmul.f32 %v5666_v14, %v1796_v16  ;;  %v1531_v53 = vsel %vm1515_vm2, %v1490_v45, %v1225_v10 }
 0x188   : >> { %v1876_v25 = vadd.f32 %v5672_v17, %v1840_v22 }
 0x189   : >> { %v1868_v24 = vadd.f32 %v5672_v17, %v1832_v21  ;;  %v1762_v28 = vpop.f32.mrf.mxu3 }
 0x18a   : >> { %v1742_v27 = vpop.f32.mrf.mxu2  ;;  %v1908_v30 = vpack.c.bf16 %v1876_v25, %v1876_v25  ;;  %v1763_v32 = vadd.f32 %v5660_v9, %v1762_v28 }
 0x18b   : >> { %v1900_v29 = vpack.c.bf16 %v1868_v24, %v1868_v24  ;;  %v1743_v31 = vadd.f32 %v5660_v9, %v1742_v27 }
 0x18c   : >> { %v1805_v37 = vmax.f32 %v1763_v32, 0.0  ;;  %4122 = vst.msk [vmem:[%s5684_s15 + $0x68] sm:$0xf] %vm751_vm0, %v1908_v30  ;;  %v1337_v49 = vpop.permute.xlu1 %1336 }
 0x18d   : >> { %4114 = vst.msk [vmem:[%s5684_s15 + $0x48] sm:$0xf] %vm751_vm0, %v1900_v29  ;;  %v1797_v36 = vmax.f32 %v1743_v31, 0.0  ;;  %v1329_v38 = vpop.permute.xlu0 %1328  ;;  %v1700_v40 = vpop.f32.mrf.mxu0  ;;  %v1564_v55 = vsel %vm1548_vm3, %v1531_v53, %v1337_v49 }
 0x18e   : >> { %v1556_v39 = vsel %vm1548_vm3, %v1523_v34, %v1329_v38  ;;  %v1841_v42 = vmul.f32 %v5666_v14, %v1805_v37  ;;  %v1701_v43 = vadd.f32 %v5660_v9, %v1700_v40 }
 0x18f   : >> { %v1833_v41 = vmul.f32 %v5666_v14, %v1797_v36  ;;  %v1589_v44 = vsel %vm1581_vm4, %v1556_v39, %v1441_v33 }
 0x190   : >> { %4083 = vmatmul.msk.bf16.gmra.mxu0 %vm1658_vm5, %v1589_v44  ;;  %v1877_v47 = vadd.f32 %v5672_v17, %v1841_v42  ;;  %v1780_v48 = vmax.f32 %v1701_v43, 0.0 }
 0x191   : >> { %v1869_v46 = vadd.f32 %v5672_v17, %v1833_v41 }
 0x192   : >> { %v1909_v51 = vpack.c.bf16 %v1877_v47, %v1877_v47  ;;  %v1816_v52 = vmul.f32 %v5666_v14, %v1780_v48 }
 0x193   : >> { %v1901_v50 = vpack.c.bf16 %v1869_v46, %v1869_v46 }
 0x194   : >> { %v1720_v54 = vpop.f32.mrf.mxu1  ;;  %v1852_v56 = vadd.f32 %v5672_v17, %v1816_v52  ;;  %4123 = vst.msk [vmem:[%s5684_s15 + $0x6c] sm:$0xf] %vm751_vm0, %v1909_v51 }
 0x195   : >> { %4115 = vst.msk [vmem:[%s5684_s15 + $0x4c] sm:$0xf] %vm751_vm0, %v1901_v50  ;;  %v1721_v57 = vadd.f32 %v5660_v9, %v1720_v54  ;;  %v1449_v58 = vpop.permute.xlu0 %1448  ;;  %v1702_v59 = vpop.f32.mrf.mxu0 }
 0x196   : >> { %v1597_v60 = vsel %vm1581_vm4, %v1564_v55, %v1449_v58  ;;  %v1884_v61 = vpack.c.bf16 %v1852_v56, %v1852_v56  ;;  %v1703_v63 = vadd.f32 %v5660_v9, %v1702_v59 }
 0x197   : >> { %v1788_v62 = vmax.f32 %v1721_v57, 0.0  ;;  %4087 = vmatmul.msk.bf16.gmra.mxu1 %vm1658_vm5, %v1597_v60 }
 0x198   : >> { %4098 = vst.msk [vmem:[%s5684_s15 + $0x8] sm:$0xf] %vm751_vm0, %v1884_v61  ;;  %v1781_v1 = vmax.f32 %v1703_v63, 0.0 }
 0x199   : >> { %v1824_v0 = vmul.f32 %v5666_v14, %v1788_v62 }
 0x19a   : >> { %v1817_v3 = vmul.f32 %v5666_v14, %v1781_v1 }
 0x19b   : >> { %v1860_v2 = vadd.f32 %v5672_v17, %v1824_v0 }
 0x19c   : >> { %v1722_v4 = vpop.f32.mrf.mxu1  ;;  %v1853_v6 = vadd.f32 %v5672_v17, %v1817_v3 }
 0x19d   : >> { %v1892_v5 = vpack.c.bf16 %v1860_v2, %v1860_v2  ;;  %v1723_v7 = vadd.f32 %v5660_v9, %v1722_v4 }
 0x19e   : >> { %v1885_v8 = vpack.c.bf16 %v1853_v6, %v1853_v6 }
 0x19f   : >> { %4106 = vst.msk [vmem:[%s5684_s15 + $0x28] sm:$0xf] %vm751_vm0, %v1892_v5  ;;  %v1789_v10 = vmax.f32 %v1723_v7, 0.0 }
 0x1a0   : >> { %4099 = vst.msk [vmem:[%s5684_s15 + $0xc] sm:$0xf] %vm751_vm0, %v1885_v8 }
 0x1a1   : >> { %v1825_v11 = vmul.f32 %v5666_v14, %v1789_v10 }
 0x1a3   : >> { %v1861_v12 = vadd.f32 %v5672_v17, %v1825_v11 }
 0x1a5   : >> { %v1893_v13 = vpack.c.bf16 %v1861_v12, %v1861_v12 }
 0x1a7   : >> { %4107 = vst.msk [vmem:[%s5684_s15 + $0x2c] sm:$0xf] %vm751_vm0, %v1893_v13 }
 0x1a9   : >> { %v1745_v15 = vpop.f32.mrf.mxu2 }
 0x1aa   : >> { %v1746_v16 = vadd.f32 %v5660_v9, %v1745_v15 }
 0x1ab   : >> { %v1765_v18 = vpop.f32.mrf.mxu3 }
 0x1ac   : >> { %v1766_v19 = vadd.f32 %v5660_v9, %v1765_v18  ;;  %v1798_v20 = vmax.f32 %v1746_v16, 0.0 }
 0x1ae   : >> { %v1806_v21 = vmax.f32 %v1766_v19, 0.0  ;;  %v1834_v22 = vmul.f32 %v5666_v14, %v1798_v20 }
 0x1b0   : >> { %v1842_v23 = vmul.f32 %v5666_v14, %v1806_v21  ;;  %v1870_v24 = vadd.f32 %v5672_v17, %v1834_v22 }
 0x1b1   : >> { %v1747_v26 = vpop.f32.mrf.mxu2 }
 0x1b2   : >> { %v1878_v25 = vadd.f32 %v5672_v17, %v1842_v23  ;;  %v1902_v27 = vpack.c.bf16 %v1870_v24, %v1870_v24  ;;  %v1748_v28 = vadd.f32 %v5660_v9, %v1747_v26 }
 0x1b3   : >> { %v1767_v29 = vpop.f32.mrf.mxu3 }
 0x1b4   : >> { %v1910_v30 = vpack.c.bf16 %v1878_v25, %v1878_v25  ;;  %v1768_v31 = vadd.f32 %v5660_v9, %v1767_v29  ;;  %4116 = vst.msk [vmem:[%s5684_s15 + $0x50] sm:$0xf] %vm751_vm0, %v1902_v27  ;;  %v1799_v32 = vmax.f32 %v1748_v28, 0.0 }
 0x1b6   : >> { %4124 = vst.msk [vmem:[%s5684_s15 + $0x70] sm:$0xf] %vm751_vm0, %v1910_v30  ;;  %v1807_v33 = vmax.f32 %v1768_v31, 0.0  ;;  %v1835_v34 = vmul.f32 %v5666_v14, %v1799_v32 }
 0x1b8   : >> { %v1843_v35 = vmul.f32 %v5666_v14, %v1807_v33  ;;  %v1871_v36 = vadd.f32 %v5672_v17, %v1835_v34 }
 0x1ba   : >> { %v1879_v37 = vadd.f32 %v5672_v17, %v1843_v35  ;;  %v1903_v38 = vpack.c.bf16 %v1871_v36, %v1871_v36 }
 0x1bb   : >> { %v1725_v41 = vpop.f32.mrf.mxu1 }
 0x1bc   : >> { %v1911_v39 = vpack.c.bf16 %v1879_v37, %v1879_v37  ;;  %v1705_v40 = vpop.f32.mrf.mxu0  ;;  %4117 = vst.msk [vmem:[%s5684_s15 + $0x54] sm:$0xf] %vm751_vm0, %v1903_v38  ;;  %v1726_v43 = vadd.f32 %v5660_v9, %v1725_v41 }
 0x1bd   : >> { %v1706_v42 = vadd.f32 %v5660_v9, %v1705_v40 }
 0x1be   : >> { %4125 = vst.msk [vmem:[%s5684_s15 + $0x74] sm:$0xf] %vm751_vm0, %v1911_v39  ;;  %v1790_v45 = vmax.f32 %v1726_v43, 0.0 }
 0x1bf   : >> { %v1782_v44 = vmax.f32 %v1706_v42, 0.0 }
 0x1c0   : >> { %v1826_v47 = vmul.f32 %v5666_v14, %v1790_v45 }
 0x1c1   : >> { %v1818_v46 = vmul.f32 %v5666_v14, %v1782_v44 }
 0x1c2   : >> { %v1862_v49 = vadd.f32 %v5672_v17, %v1826_v47 }
 0x1c3   : >> { %v1854_v48 = vadd.f32 %v5672_v17, %v1818_v46  ;;  %v1727_v51 = vpop.f32.mrf.mxu1 }
 0x1c4   : >> { %v1707_v50 = vpop.f32.mrf.mxu0  ;;  %v1894_v53 = vpack.c.bf16 %v1862_v49, %v1862_v49  ;;  %v1728_v55 = vadd.f32 %v5660_v9, %v1727_v51 }
 0x1c5   : >> { %v1886_v52 = vpack.c.bf16 %v1854_v48, %v1854_v48  ;;  %v1708_v54 = vadd.f32 %v5660_v9, %v1707_v50 }
 0x1c6   : >> { %v1791_v57 = vmax.f32 %v1728_v55, 0.0  ;;  %4108 = vst.msk [vmem:[%s5684_s15 + $0x30] sm:$0xf] %vm751_vm0, %v1894_v53 }
 0x1c7   : >> { %4100 = vst.msk [vmem:[%s5684_s15 + $0x10] sm:$0xf] %vm751_vm0, %v1886_v52  ;;  %v1783_v56 = vmax.f32 %v1708_v54, 0.0 }
 0x1c8   : >> { %v1827_v59 = vmul.f32 %v5666_v14, %v1791_v57 }
 0x1c9   : >> { %v1819_v58 = vmul.f32 %v5666_v14, %v1783_v56 }
 0x1ca   : >> { %v1863_v61 = vadd.f32 %v5672_v17, %v1827_v59 }
 0x1cb   : >> { %v1855_v60 = vadd.f32 %v5672_v17, %v1819_v58 }
 0x1cc   : >> { %v1895_v63 = vpack.c.bf16 %v1863_v61, %v1863_v61 }
 0x1cd   : >> { %v1887_v62 = vpack.c.bf16 %v1855_v60, %v1855_v60 }
 0x1ce   : >> { %4109 = vst.msk [vmem:[%s5684_s15 + $0x34] sm:$0xf] %vm751_vm0, %v1895_v63 }
 0x1cf   : >> { %4101 = vst.msk [vmem:[%s5684_s15 + $0x14] sm:$0xf] %vm751_vm0, %v1887_v62 }
 0x1d3   : >> { %v1750_v0 = vpop.f32.mrf.mxu2 }
 0x1d4   : >> { %v1751_v1 = vadd.f32 %v5660_v9, %v1750_v0 }
 0x1d6   : >> { %v1800_v2 = vmax.f32 %v1751_v1, 0.0 }
 0x1d8   : >> { %v1836_v3 = vmul.f32 %v5666_v14, %v1800_v2 }
 0x1da   : >> { %v1872_v4 = vadd.f32 %v5672_v17, %v1836_v3  ;;  %v1770_v5 = vpop.f32.mrf.mxu3 }
 0x1db   : >> { %v1771_v6 = vadd.f32 %v5660_v9, %v1770_v5  ;;  %v1752_v7 = vpop.f32.mrf.mxu2 }
 0x1dc   : >> { %v1904_v8 = vpack.c.bf16 %v1872_v4, %v1872_v4  ;;  %v1753_v10 = vadd.f32 %v5660_v9, %v1752_v7 }
 0x1dd   : >> { %v1808_v11 = vmax.f32 %v1771_v6, 0.0 }
 0x1de   : >> { %4118 = vst.msk [vmem:[%s5684_s15 + $0x58] sm:$0xf] %vm751_vm0, %v1904_v8  ;;  %v1801_v12 = vmax.f32 %v1753_v10, 0.0 }
 0x1df   : >> { %v1844_v13 = vmul.f32 %v5666_v14, %v1808_v11 }
 0x1e0   : >> { %v1837_v15 = vmul.f32 %v5666_v14, %v1801_v12 }
 0x1e1   : >> { %v1880_v16 = vadd.f32 %v5672_v17, %v1844_v13 }
 0x1e2   : >> { %v1873_v18 = vadd.f32 %v5672_v17, %v1837_v15  ;;  %v1772_v19 = vpop.f32.mrf.mxu3 }
 0x1e3   : >> { %v1912_v20 = vpack.c.bf16 %v1880_v16, %v1880_v16  ;;  %v1773_v21 = vadd.f32 %v5660_v9, %v1772_v19  ;;  %v1710_v23 = vpop.f32.mrf.mxu0 }
 0x1e4   : >> { %v1905_v22 = vpack.c.bf16 %v1873_v18, %v1873_v18  ;;  %v1711_v25 = vadd.f32 %v5660_v9, %v1710_v23 }
 0x1e5   : >> { %4126 = vst.msk [vmem:[%s5684_s15 + $0x78] sm:$0xf] %vm751_vm0, %v1912_v20  ;;  %v1809_v24 = vmax.f32 %v1773_v21, 0.0  ;;  %v1730_v26 = vpop.f32.mrf.mxu1 }
 0x1e6   : >> { %4119 = vst.msk [vmem:[%s5684_s15 + $0x5c] sm:$0xf] %vm751_vm0, %v1905_v22  ;;  %v1731_v27 = vadd.f32 %v5660_v9, %v1730_v26  ;;  %v1784_v29 = vmax.f32 %v1711_v25, 0.0 }
 0x1e7   : >> { %v1845_v28 = vmul.f32 %v5666_v14, %v1809_v24 }
 0x1e8   : >> { %v1792_v30 = vmax.f32 %v1731_v27, 0.0  ;;  %v1820_v32 = vmul.f32 %v5666_v14, %v1784_v29 }
 0x1e9   : >> { %v1881_v31 = vadd.f32 %v5672_v17, %v1845_v28 }
 0x1ea   : >> { %v1828_v33 = vmul.f32 %v5666_v14, %v1792_v30  ;;  %v1856_v35 = vadd.f32 %v5672_v17, %v1820_v32 }
 0x1eb   : >> { %v1913_v34 = vpack.c.bf16 %v1881_v31, %v1881_v31  ;;  %v1712_v37 = vpop.f32.mrf.mxu0 }
 0x1ec   : >> { %v1864_v36 = vadd.f32 %v5672_v17, %v1828_v33  ;;  %v1888_v38 = vpack.c.bf16 %v1856_v35, %v1856_v35  ;;  %v1713_v39 = vadd.f32 %v5660_v9, %v1712_v37 }
 0x1ed   : >> { %4127 = vst.msk [vmem:[%s5684_s15 + $0x7c] sm:$0xf] %vm751_vm0, %v1913_v34  ;;  %v1732_v40 = vpop.f32.mrf.mxu1 }
 0x1ee   : >> { %v1896_v41 = vpack.c.bf16 %v1864_v36, %v1864_v36  ;;  %v1733_v42 = vadd.f32 %v5660_v9, %v1732_v40  ;;  %4102 = vst.msk [vmem:[%s5684_s15 + $0x18] sm:$0xf] %vm751_vm0, %v1888_v38  ;;  %v1785_v43 = vmax.f32 %v1713_v39, 0.0 }
 0x1f0   : >> { %4110 = vst.msk [vmem:[%s5684_s15 + $0x38] sm:$0xf] %vm751_vm0, %v1896_v41  ;;  %v1793_v44 = vmax.f32 %v1733_v42, 0.0  ;;  %v1821_v45 = vmul.f32 %v5666_v14, %v1785_v43 }
 0x1f2   : >> { %v1829_v46 = vmul.f32 %v5666_v14, %v1793_v44  ;;  %v1857_v47 = vadd.f32 %v5672_v17, %v1821_v45 }
 0x1f4   : >> { %v1865_v48 = vadd.f32 %v5672_v17, %v1829_v46  ;;  %v1889_v49 = vpack.c.bf16 %v1857_v47, %v1857_v47 }
 0x1f6   : >> { %v1897_v50 = vpack.c.bf16 %v1865_v48, %v1865_v48  ;;  %4103 = vst.msk [vmem:[%s5684_s15 + $0x1c] sm:$0xf] %vm751_vm0, %v1889_v49 }
 0x1f8   : >> { %4111 = vst.msk [vmem:[%s5684_s15 + $0x3c] sm:$0xf] %vm751_vm0, %v1897_v50 }
 0x201   : >> { %v1775_v52 = vpop.f32.mrf.mxu3 }
 0x202   : >> { %v1755_v51 = vpop.f32.mrf.mxu2  ;;  %v1776_v54 = vadd.f32 %v5660_v9, %v1775_v52 }
 0x203   : >> { %v1756_v53 = vadd.f32 %v5660_v9, %v1755_v51 }
 0x204   : >> { %v1810_v56 = vmax.f32 %v1776_v54, 0.0 }
 0x205   : >> { %v1802_v55 = vmax.f32 %v1756_v53, 0.0 }
 0x206   : >> { %v1846_v58 = vmul.f32 %v5666_v14, %v1810_v56 }
 0x207   : >> { %v1838_v57 = vmul.f32 %v5666_v14, %v1802_v55 }
 0x208   : >> { %v1882_v60 = vadd.f32 %v5672_v17, %v1846_v58 }
 0x209   : >> { %v1874_v59 = vadd.f32 %v5672_v17, %v1838_v57  ;;  %v1777_v62 = vpop.f32.mrf.mxu3 }
 0x20a   : >> { %v1757_v61 = vpop.f32.mrf.mxu2  ;;  %v1914_v0 = vpack.c.bf16 %v1882_v60, %v1882_v60  ;;  %v1778_v2 = vadd.f32 %v5660_v9, %v1777_v62 }
 0x20b   : >> { %v1906_v63 = vpack.c.bf16 %v1874_v59, %v1874_v59  ;;  %v1758_v1 = vadd.f32 %v5660_v9, %v1757_v61 }
 0x20c   : >> { %v1811_v4 = vmax.f32 %v1778_v2, 0.0  ;;  %4128 = vst.msk [vmem:[%s5684_s15 + $0x80] sm:$0xf] %vm751_vm0, %v1914_v0 }
 0x20d   : >> { %4120 = vst.msk [vmem:[%s5684_s15 + $0x60] sm:$0xf] %vm751_vm0, %v1906_v63  ;;  %v1803_v3 = vmax.f32 %v1758_v1, 0.0  ;;  %v1715_v5 = vpop.f32.mrf.mxu0 }
 0x20e   : >> { %v1716_v6 = vadd.f32 %v5660_v9, %v1715_v5  ;;  %v1847_v8 = vmul.f32 %v5666_v14, %v1811_v4 }
 0x20f   : >> { %v1839_v7 = vmul.f32 %v5666_v14, %v1803_v3 }
 0x210   : >> { %v1786_v10 = vmax.f32 %v1716_v6, 0.0  ;;  %v1883_v12 = vadd.f32 %v5672_v17, %v1847_v8 }
 0x211   : >> { %v1875_v11 = vadd.f32 %v5672_v17, %v1839_v7 }
 0x212   : >> { %v1822_v13 = vmul.f32 %v5666_v14, %v1786_v10  ;;  %v1915_v16 = vpack.c.bf16 %v1883_v12, %v1883_v12 }
 0x213   : >> { %v1907_v15 = vpack.c.bf16 %v1875_v11, %v1875_v11 }
 0x214   : >> { %v1858_v18 = vadd.f32 %v5672_v17, %v1822_v13  ;;  %v1735_v19 = vpop.f32.mrf.mxu1  ;;  %4129 = vst.msk [vmem:[%s5684_s15 + $0x84] sm:$0xf] %vm751_vm0, %v1915_v16 }
 0x215   : >> { %4121 = vst.msk [vmem:[%s5684_s15 + $0x64] sm:$0xf] %vm751_vm0, %v1907_v15  ;;  %v1736_v20 = vadd.f32 %v5660_v9, %v1735_v19  ;;  %v1717_v21 = vpop.f32.mrf.mxu0 }
 0x216   : >> { %v1890_v22 = vpack.c.bf16 %v1858_v18, %v1858_v18  ;;  %v1718_v23 = vadd.f32 %v5660_v9, %v1717_v21 }
 0x217   : >> { %v1794_v24 = vmax.f32 %v1736_v20, 0.0 }
 0x218   : >> { %4104 = vst.msk [vmem:[%s5684_s15 + $0x20] sm:$0xf] %vm751_vm0, %v1890_v22  ;;  %v1787_v25 = vmax.f32 %v1718_v23, 0.0 }
 0x219   : >> { %v1830_v26 = vmul.f32 %v5666_v14, %v1794_v24 }
 0x21a   : >> { %v1823_v27 = vmul.f32 %v5666_v14, %v1787_v25 }
 0x21b   : >> { %v1866_v28 = vadd.f32 %v5672_v17, %v1830_v26 }
 0x21c   : >> { %v1859_v29 = vadd.f32 %v5672_v17, %v1823_v27  ;;  %v1737_v30 = vpop.f32.mrf.mxu1 }
 0x21d   : >> { %v1898_v31 = vpack.c.bf16 %v1866_v28, %v1866_v28  ;;  %v1738_v32 = vadd.f32 %v5660_v9, %v1737_v30  ;;  %v5851_v9 = vmov (%p759_p13), 0.0  }
 0x21e   : >> { %v1891_v33 = vpack.c.bf16 %v1859_v29, %v1859_v29 }
 0x21f   : >> { %4112 = vst.msk [vmem:[%s5684_s15 + $0x40] sm:$0xf] %vm751_vm0, %v1898_v31  ;;  %v1795_v34 = vmax.f32 %v1738_v32, 0.0 }
 0x220   : >> { %4105 = vst.msk [vmem:[%s5684_s15 + $0x24] sm:$0xf] %vm751_vm0, %v1891_v33 }
 0x221   : >> { %v1831_v35 = vmul.f32 %v5666_v14, %v1795_v34 }
 0x223   : >> { %v1867_v36 = vadd.f32 %v5672_v17, %v1831_v35  ;;  %761 = sbr.rel (!%p759_p13) target bundleno = 114 (0x72), region = 179 }
 0x225   : >> { %v1899_v37 = vpack.c.bf16 %v1867_v36, %v1867_v36 }
 0x227   : >> { %4113 = vst.msk [vmem:[%s5684_s15 + $0x44] sm:$0xf] %vm751_vm0, %v1899_v37 }
 0x228 LB: >> { %v4915_v14 = vld [vmem:[%s6443_s5 + $0x48] sm:$0xff]  ;;  %s4821_s22 = sshll.u32 %s5127_s30, 7  ;;  %v4914_v17 = vld [vmem:[%s6443_s5 + $0x40] sm:$0xff]  ;;  %s5134_s20 = smov 32   ;;  %v4913_v63 = vld [vmem:[%s6443_s5 + $0x38] sm:$0xff]  ;;  %vm2710_vm6 = vcmask 785408   ;;  %s5127_s30 = sphi %s5853_s30, %s1955_s30   ;;  %v5123_v9 = vphi %v5851_v9, %v6478_v9  }
 0x229   : >> { %2986 = vmatpush.bf16.msra.mxu1 %v4915_v14  ;;  %4959 = vmatpush.bf16.msra.mxu3 %v4915_v14  ;;  %s5868_s29 = scalar_lea.vmem [#allocation2], %s4821_s22  ;;  %s5135_s0 = smov 96   ;;  %v4912_v3 = vld [vmem:[%s6443_s5 + $0x30] sm:$0xff]  ;;  %v4911_v4 = vld [vmem:[%s6443_s5 + $0x28] sm:$0xff]  ;;  %v4910_v10 = vld [vmem:[%s6443_s5 + $0x20] sm:$0xff] }
 0x22a   : >> { %s5136_s15 = smov 64   ;;  %2891 = vmatpush.bf16.msra.mxu0 %v4913_v63  ;;  %4951 = vmatpush.bf16.msra.mxu2 %v4913_v63  ;;  %v4909_v11 = vld [vmem:[%s6443_s5 + $0x18] sm:$0xff]  ;;  %v4908_v16 = vld [vmem:[%s6443_s5 + $0x10] sm:$0xff]  ;;  %v4907_v22 = vld [vmem:[%s6443_s5 + $0x8] sm:$0xff]  ;;  %s1955_s30 = sadd.s32 1, %s5127_s30  }
 0x22b   : >> { %v4906_v25 = vld [vmem:[%s6443_s5] sm:$0xff]  ;;  %p1952_p0 = scmp.ge.s32.totalorder %s1955_s30, 2  }
 0x22c   : > { %s3475_s27 = sshll.u32 (%p1952_p0), %s5414_s23, 4  ;;  %s3476_s27 = int_to_ptr.vmem [resolvable:$true] %s3475_s27 }
 0x22d   : >> { %2987 = vmatpush.bf16.msra.mxu1 %v4914_v17  ;;  %4960 = vmatpush.bf16.msra.mxu3 %v4914_v17 }
 0x22e   : >> { %v4839_v38 = vld [vmem:[%s5868_s29 + $0x4] sm:$0xff]  ;;  %v4873_v39 = vld [vmem:[%s5868_s29 + $0xc] sm:$0xff]  ;;  %v4874_v44 = vld [vmem:[%s5868_s29 + $0x14] sm:$0xff]  ;;  %2892 = vmatpush.bf16.msra.mxu0 %v4912_v3  ;;  %4952 = vmatpush.bf16.msra.mxu2 %v4912_v3 }
 0x22f   : >> { %2292 = vrot.lane.b32.xlu0 %v4839_v38, %s5134_s20  ;;  %2516 = vrot.lane.b32.xlu1 %v4873_v39, %s5135_s0  ;;  %v4890_v40 = vld [vmem:[%s5868_s29 + $0x10] sm:$0xff]  ;;  %v4856_v42 = vld [vmem:[%s5868_s29 + $0x8] sm:$0xff] }
 0x230   : >> { %v4857_v41 = vld [vmem:[%s5868_s29 + $0x10] sm:$0xff]  ;;  %4628 = vmatmul.msk.bf16.vlgmr.msra.gmra.mxu1 %vm1515_vm2, %v4890_v40  ;;  %v4847_v45 = vld [vmem:[%s5868_s29 + $0x44] sm:$0xff]  ;;  %v4891_v48 = vld [vmem:[%s5868_s29 + $0x18] sm:$0xff] }
 0x231   : >> { %2406 = vrot.lane.b32.xlu2 %v4857_v41, %s5136_s15  ;;  %v4840_v43 = vld [vmem:[%s5868_s29 + $0xc] sm:$0xff]  ;;  %v4841_v49 = vld [vmem:[%s5868_s29 + $0x14] sm:$0xff]  ;;  %v4875_v51 = vld [vmem:[%s5868_s29 + $0x1c] sm:$0xff] }
 0x232   : >> { %v4864_v46 = vld [vmem:[%s5868_s29 + $0x48] sm:$0xff]  ;;  %v4858_v50 = vld [vmem:[%s5868_s29 + $0x18] sm:$0xff]  ;;  %v4865_v53 = vld [vmem:[%s5868_s29 + $0x50] sm:$0xff]  ;;  %2893 = vmatpush.bf16.msra.mxu0 %v4911_v4  ;;  %4953 = vmatpush.bf16.msra.mxu2 %v4911_v4 }
 0x233   : >> { %v4881_v47 = vld [vmem:[%s5868_s29 + $0x4c] sm:$0xff]  ;;  %v4882_v54 = vld [vmem:[%s5868_s29 + $0x54] sm:$0xff]  ;;  %v4892_v55 = vld [vmem:[%s5868_s29 + $0x20] sm:$0xff] }
 0x234   : >> { %v4848_v52 = vld [vmem:[%s5868_s29 + $0x4c] sm:$0xff]  ;;  %v4842_v56 = vld [vmem:[%s5868_s29 + $0x1c] sm:$0xff]  ;;  %v4876_v58 = vld [vmem:[%s5868_s29 + $0x24] sm:$0xff] }
 0x235   : >> { %v4859_v57 = vld [vmem:[%s5868_s29 + $0x20] sm:$0xff]  ;;  %v4849_v59 = vld [vmem:[%s5868_s29 + $0x54] sm:$0xff]  ;;  %v4893_v62 = vld [vmem:[%s5868_s29 + $0x28] sm:$0xff] }
 0x236   : >> { %v4866_v60 = vld [vmem:[%s5868_s29 + $0x58] sm:$0xff]  ;;  %v4843_v0 = vld [vmem:[%s5868_s29 + $0x24] sm:$0xff]  ;;  %v4877_v2 = vld [vmem:[%s5868_s29 + $0x2c] sm:$0xff]  ;;  %2894 = vmatpush.bf16.msra.mxu0 %v4910_v10  ;;  %4954 = vmatpush.bf16.msra.mxu2 %v4910_v10 }
 0x237   : >> { %2404 = vrot.lane.b32.xlu0 %v4856_v42, %s5136_s15  ;;  %2294 = vrot.lane.b32.xlu1 %v4840_v43, %s5134_s20  ;;  %v4883_v61 = vld [vmem:[%s5868_s29 + $0x5c] sm:$0xff]  ;;  %v4860_v1 = vld [vmem:[%s5868_s29 + $0x28] sm:$0xff] }
 0x238   : >> { %v4850_v5 = vld [vmem:[%s5868_s29 + $0x5c] sm:$0xff]  ;;  %v4884_v7 = vld [vmem:[%s5868_s29 + $0x64] sm:$0xff]  ;;  %v4894_v8 = vld [vmem:[%s5868_s29 + $0x30] sm:$0xff] }
 0x239   : >> { %2518 = vrot.lane.b32.xlu2 %v4874_v44, %s5135_s0  ;;  %v4867_v6 = vld [vmem:[%s5868_s29 + $0x60] sm:$0xff]  ;;  %v4844_v12 = vld [vmem:[%s5868_s29 + $0x2c] sm:$0xff]  ;;  %v4878_v15 = vld [vmem:[%s5868_s29 + $0x34] sm:$0xff] }
 0x23a   : >> { %v4861_v13 = vld [vmem:[%s5868_s29 + $0x30] sm:$0xff]  ;;  %2895 = vmatpush.bf16.msra.mxu0 %v4909_v11  ;;  %4955 = vmatpush.bf16.msra.mxu2 %v4909_v11  ;;  %v4851_v18 = vld [vmem:[%s5868_s29 + $0x64] sm:$0xff]  ;;  %v4895_v21 = vld [vmem:[%s5868_s29 + $0x38] sm:$0xff] }
 0x23b   : >> { %v4868_v19 = vld [vmem:[%s5868_s29 + $0x68] sm:$0xff]  ;;  %v4845_v23 = vld [vmem:[%s5868_s29 + $0x34] sm:$0xff]  ;;  %v4879_v26 = vld [vmem:[%s5868_s29 + $0x3c] sm:$0xff] }
 0x23c   : >> { %v4885_v20 = vld [vmem:[%s5868_s29 + $0x6c] sm:$0xff]  ;;  %v4862_v24 = vld [vmem:[%s5868_s29 + $0x38] sm:$0xff]  ;;  %v4896_v31 = vld [vmem:[%s5868_s29 + $0x40] sm:$0xff] }
 0x23d   : >> { %v4852_v27 = vld [vmem:[%s5868_s29 + $0x6c] sm:$0xff]  ;;  %v4886_v30 = vld [vmem:[%s5868_s29 + $0x74] sm:$0xff]  ;;  %v4846_v32 = vld [vmem:[%s5868_s29 + $0x3c] sm:$0xff] }
 0x23e   : >> { %2896 = vmatpush.bf16.msra.mxu0 %v4908_v16  ;;  %4956 = vmatpush.bf16.msra.mxu2 %v4908_v16  ;;  %v4869_v28 = vld [vmem:[%s5868_s29 + $0x70] sm:$0xff]  ;;  %v4863_v33 = vld [vmem:[%s5868_s29 + $0x40] sm:$0xff]  ;;  %v4870_v37 = vld [vmem:[%s5868_s29 + $0x78] sm:$0xff] }
 0x23f   : >> { %2308 = vrot.lane.b32.xlu0 %v4847_v45, %s5134_s20  ;;  %2420 = vrot.lane.b32.xlu1 %v4864_v46, %s5136_s15  ;;  %v4880_v35 = vld [vmem:[%s5868_s29 + $0x44] sm:$0xff]  ;;  %v4853_v36 = vld [vmem:[%s5868_s29 + $0x74] sm:$0xff] }
 0x240   : >> { %4629 = vmatmul.msk.bf16.gmra.mxu1 %vm1515_vm2, %v4891_v48  ;;  %v4887_v17 = vld [vmem:[%s5868_s29 + $0x7c] sm:$0xff]  ;;  %v4897_v38 = vld [vmem:[%s5868_s29 + $0x48] sm:$0xff] }
 0x241   : >> { %2532 = vrot.lane.b32.xlu2 %v4881_v47, %s5135_s0  ;;  %v4854_v41 = vld [vmem:[%s5868_s29 + $0x7c] sm:$0xff]  ;;  %v4831_v4 = vld [vmem:[%s5868_s29 + $0x48] sm:$0xff] }
 0x242   : >> { %2897 = vmatpush.bf16.msra.mxu0 %v4907_v22  ;;  %4957 = vmatpush.bf16.msra.mxu2 %v4907_v22  ;;  %v4871_v42 = vld [vmem:[%s5868_s29 + $0x80] sm:$0xff]  ;;  %v4832_v22 = vld [vmem:[%s5868_s29 + $0x50] sm:$0xff] }
 0x243   : >> { %v4822_v44 = vld [vmem:[%s5868_s29] sm:$0xff] }
 0x244   : >> { %v4900_v3 = vld [vmem:[%s5868_s29 + $0x60] sm:$0xff] }
 0x246   : >> { %2898 = vmatpush.bf16.msra.mxu0 %v4906_v25  ;;  %4958 = vmatpush.bf16.msra.mxu2 %v4906_v25 }
 0x247   : >> { %2296 = vrot.lane.b32.xlu0 %v4841_v49, %s5134_s20  ;;  %2408 = vrot.lane.b32.xlu1 %v4858_v50, %s5136_s15  ;;  %v4899_v50 = vld [vmem:[%s5868_s29 + $0x58] sm:$0xff] }
 0x248   : >> { %4637 = vmatmul.msk.bf16.vlgmr.msra.gmra.mxu3 %vm1515_vm2, %v4899_v50  ;;  %v4827_v50 = vld [vmem:[%s5868_s29 + $0x28] sm:$0xff] }
 0x249   : >> { %2520 = vrot.lane.b32.xlu2 %v4875_v51, %s5135_s0  ;;  %v4888_v51 = vld [vmem:[%s5868_s29 + $0x84] sm:$0xff] }
 0x24f   : >> { %2310 = vrot.lane.b32.xlu0 %v4848_v52, %s5134_s20  ;;  %2422 = vrot.lane.b32.xlu1 %v4865_v53, %s5136_s15  ;;  %v4830_v52 = vld [vmem:[%s5868_s29 + $0x40] sm:$0xff] }
 0x250   : >> { %4630 = vmatmul.msk.bf16.gmra.mxu1 %vm1515_vm2, %v4892_v55  ;;  %v4823_v55 = vld [vmem:[%s5868_s29 + $0x8] sm:$0xff] }
 0x251   : >> { %2534 = vrot.lane.b32.xlu2 %v4882_v54, %s5135_s0  ;;  %v4898_v54 = vld [vmem:[%s5868_s29 + $0x50] sm:$0xff] }
 0x257   : >> { %2298 = vrot.lane.b32.xlu0 %v4842_v56, %s5134_s20  ;;  %2410 = vrot.lane.b32.xlu1 %v4859_v57, %s5136_s15 }
 0x258   : >> { %4638 = vmatmul.msk.bf16.gmra.mxu3 %vm1515_vm2, %v4900_v3  ;;  %v4828_v3 = vld [vmem:[%s5868_s29 + $0x30] sm:$0xff] }
 0x259   : >> { %2522 = vrot.lane.b32.xlu2 %v4876_v58, %s5135_s0 }
 0x25f   : >> { %2312 = vrot.lane.b32.xlu0 %v4849_v59, %s5134_s20  ;;  %2424 = vrot.lane.b32.xlu1 %v4866_v60, %s5136_s15 }
 0x260   : >> { %4631 = vmatmul.msk.bf16.gmra.mxu1 %vm1515_vm2, %v4893_v62 }
 0x261   : >> { %2536 = vrot.lane.b32.xlu2 %v4883_v61, %s5135_s0 }
 0x267   : >> { %2300 = vrot.lane.b32.xlu0 %v4843_v0, %s5134_s20  ;;  %2412 = vrot.lane.b32.xlu1 %v4860_v1, %s5136_s15 }
 0x269   : >> { %2524 = vrot.lane.b32.xlu2 %v4877_v2, %s5135_s0 }
 0x26f   : >> { %2314 = vrot.lane.b32.xlu0 %v4850_v5, %s5134_s20  ;;  %2426 = vrot.lane.b32.xlu1 %v4867_v6, %s5136_s15  ;;  %v4824_v5 = vld [vmem:[%s5868_s29 + $0x10] sm:$0xff] }
 0x270   : >> { %4632 = vmatmul.msk.bf16.gmra.mxu1 %vm1515_vm2, %v4894_v8 }
 0x271   : >> { %2538 = vrot.lane.b32.xlu2 %v4884_v7, %s5135_s0 }
 0x277   : >> { %2302 = vrot.lane.b32.xlu0 %v4844_v12, %s5134_s20  ;;  %2414 = vrot.lane.b32.xlu1 %v4861_v13, %s5136_s15 }
 0x279   : >> { %2526 = vrot.lane.b32.xlu2 %v4878_v15, %s5135_s0 }
 0x27f   : >> { %2316 = vrot.lane.b32.xlu0 %v4851_v18, %s5134_s20  ;;  %2428 = vrot.lane.b32.xlu1 %v4868_v19, %s5136_s15 }
 0x280   : >> { %4633 = vmatmul.msk.bf16.gmra.mxu1 %vm1515_vm2, %v4895_v21  ;;  %v4901_v21 = vld [vmem:[%s5868_s29 + $0x68] sm:$0xff] }
 0x281   : >> { %2540 = vrot.lane.b32.xlu2 %v4885_v20, %s5135_s0  ;;  %4639 = vmatmul.msk.bf16.gmra.mxu3 %vm1515_vm2, %v4901_v21  ;;  %v4829_v21 = vld [vmem:[%s5868_s29 + $0x38] sm:$0xff] }
 0x287   : >> { %2304 = vrot.lane.b32.xlu0 %v4845_v23, %s5134_s20  ;;  %2416 = vrot.lane.b32.xlu1 %v4862_v24, %s5136_s15  ;;  %v4825_v23 = vld [vmem:[%s5868_s29 + $0x18] sm:$0xff] }
 0x289   : >> { %2528 = vrot.lane.b32.xlu2 %v4879_v26, %s5135_s0 }
 0x28b   : >> { %v2407_v29 = vpop.permute.xlu2 %2406 }
 0x28f   : >> { %2318 = vrot.lane.b32.xlu0 %v4852_v27, %s5134_s20  ;;  %2430 = vrot.lane.b32.xlu1 %v4869_v28, %s5136_s15 }
 0x290   : >> { %4634 = vmatmul.msk.bf16.gmra.mxu1 %vm1515_vm2, %v4896_v31 }
 0x291   : >> { %2542 = vrot.lane.b32.xlu2 %v4886_v30, %s5135_s0 }
 0x293   : >> { %v2519_v34 = vpop.permute.xlu2 %2518 }
 0x297   : >> { %2306 = vrot.lane.b32.xlu0 %v4846_v32, %s5134_s20  ;;  %2418 = vrot.lane.b32.xlu1 %v4863_v33, %s5136_s15 }
 0x299   : >> { %2530 = vrot.lane.b32.xlu2 %v4880_v35, %s5135_s0  ;;  %v4902_v35 = vld [vmem:[%s5868_s29 + $0x70] sm:$0xff] }
 0x29a   : >> { %4640 = vmatmul.msk.bf16.gmra.mxu3 %vm1515_vm2, %v4902_v35 }
 0x29b   : >> { %v2533_v14 = vpop.permute.xlu2 %2532 }
 0x29f   : >> { %2320 = vrot.lane.b32.xlu0 %v4853_v36, %s5134_s20  ;;  %2432 = vrot.lane.b32.xlu1 %v4870_v37, %s5136_s15  ;;  %v4833_v36 = vld [vmem:[%s5868_s29 + $0x58] sm:$0xff]  ;;  %v4826_v37 = vld [vmem:[%s5868_s29 + $0x20] sm:$0xff] }
 0x2a0   : >> { %4635 = vmatmul.msk.bf16.gmra.mxu1 %vm1515_vm2, %v4897_v38 }
 0x2a1   : >> { %v2293_v39 = vpop.permute.xlu0 %2292  ;;  %v2517_v40 = vpop.permute.xlu1 %2516  ;;  %2544 = vrot.lane.b32.xlu2 %v4887_v17, %s5135_s0 }
 0x2a2   : >> { %v2631_v45 = vsel %vm1515_vm2, %v4822_v44, %v2293_v39 }
 0x2a3   : >> { %v2521_v43 = vpop.permute.xlu2 %2520 }
 0x2a7   : >> { %2322 = vrot.lane.b32.xlu0 %v4854_v41, %s5134_s20  ;;  %2434 = vrot.lane.b32.xlu1 %v4871_v42, %s5136_s15  ;;  %s6479_s15 = sadd.s32 (%p1952_p0), 4294967295, %s5115_s28  }
 0x2a8   : > { %s4727_s17 = sshll.u32 (%p1952_p0), %s6479_s15, 3 }
 0x2a9   : >> { %v2405_v46 = vpop.permute.xlu0 %2404  ;;  %v2295_v47 = vpop.permute.xlu1 %2294  ;;  %2546 = vrot.lane.b32.xlu2 %v4888_v51, %s5135_s0  ;;  %s3473_s21 = scalar_lea.hbm (%p1952_p0), %s6451_s13, %s4727_s17  ;;  %s3463_s0 = scalar_lea.sflag (%p1952_p0), [#allocation5], %s5404_s16 }
 0x2aa   : >> { %v2679_v48 = vsel %vm1581_vm4, %v2631_v45, %v2405_v46  ;;  %v2634_v61 = vsel %vm1515_vm2, %v4823_v55, %v2295_v47  ;;  %s3477_s20 = sshll.u32 (%p1952_p0), %s3473_s21, 4  ;;  %s5061_s17 = scalar_lea.hbm (%p1952_p0), %s6451_s13, 16  ;;  %s3478_s20 = int_to_ptr.hbm [resolvable:$true] %s3477_s20 }
 0x2ab   : >> { %v2712_v49 = vsel %vm2710_vm6, %v2679_v48, %v2517_v40  ;;  %v2535_v53 = vpop.permute.xlu2 %2534  ;;  %v2681_v62 = vsel %vm1581_vm4, %v2634_v61, %v2407_v29  ;;  %v4903_v48 = vld [vmem:[%s5868_s29 + $0x78] sm:$0xff] }
 0x2ac   : >> { %2899 = vmatmul.bf16.vlgmr.msra.gmra.mxu0 %v2712_v49  ;;  %v2715_v2 = vsel %vm2710_vm6, %v2681_v62, %v2519_v34  ;;  %v4834_v49 = vld [vmem:[%s5868_s29 + $0x60] sm:$0xff]  ;;  %4641 = vmatmul.msk.bf16.gmra.mxu3 %vm1515_vm2, %v4903_v48 }
 0x2b0   : >> { %4636 = vmatmul.msk.bf16.gmra.mxu1 %vm1515_vm2, %v4898_v54 }
 0x2b1   : >> { %v2309_v56 = vpop.permute.xlu0 %2308  ;;  %v2421_v57 = vpop.permute.xlu1 %2420 }
 0x2b2   : >> { %v2655_v58 = vsel %vm1515_vm2, %v4830_v52, %v2309_v56 }
 0x2b3   : >> { %v2695_v59 = vsel %vm1581_vm4, %v2655_v58, %v2421_v57  ;;  %v2523_v63 = vpop.permute.xlu2 %2522 }
 0x2b4   : >> { %v2736_v60 = vsel %vm2710_vm6, %v2695_v59, %v2533_v14 }
 0x2b5   : >> { %2939 = vmatmul.bf16.vlgmr.msra.gmra.mxu2 %v2736_v60 }
 0x2b9   : >> { %v2297_v0 = vpop.permute.xlu0 %2296  ;;  %v2409_v1 = vpop.permute.xlu1 %2408 }
 0x2ba   : >> { %v2637_v11 = vsel %vm1515_vm2, %v4824_v5, %v2297_v0  ;;  %v4904_v0 = vld [vmem:[%s5868_s29 + $0x80] sm:$0xff] }
 0x2bb   : >> { %v2537_v10 = vpop.permute.xlu2 %2536  ;;  %v2683_v15 = vsel %vm1581_vm4, %v2637_v11, %v2409_v1  ;;  %v4835_v1 = vld [vmem:[%s5868_s29 + $0x68] sm:$0xff] }
 0x2bc   : >> { %2904 = vmatmul.bf16.gmra.mxu0 %v2715_v2  ;;  %v2718_v16 = vsel %vm2710_vm6, %v2683_v15, %v2521_v43  ;;  %4642 = vmatmul.msk.bf16.gmra.mxu3 %vm1515_vm2, %v4904_v0 }
 0x2c1   : >> { %v2311_v6 = vpop.permute.xlu0 %2310  ;;  %v2423_v7 = vpop.permute.xlu1 %2422 }
 0x2c2   : >> { %v2658_v8 = vsel %vm1515_vm2, %v4831_v4, %v2311_v6 }
 0x2c3   : >> { %v2697_v12 = vsel %vm1581_vm4, %v2658_v8, %v2423_v7  ;;  %v2525_v20 = vpop.permute.xlu2 %2524 }
 0x2c4   : >> { %v2739_v13 = vsel %vm2710_vm6, %v2697_v12, %v2535_v53  ;;  %v2989_v53 = vpop.f32.mrf.mxu1 }
 0x2c5   : >> { %2944 = vmatmul.bf16.gmra.mxu2 %v2739_v13 }
 0x2c9   : >> { %v2299_v18 = vpop.permute.xlu0 %2298  ;;  %v2411_v19 = vpop.permute.xlu1 %2410 }
 0x2ca   : >> { %v2640_v27 = vsel %vm1515_vm2, %v4825_v23, %v2299_v18 }
 0x2cb   : >> { %v2685_v30 = vsel %vm1581_vm4, %v2640_v27, %v2411_v19  ;;  %v2539_v31 = vpop.permute.xlu2 %2538  ;;  %v4836_v19 = vld [vmem:[%s5868_s29 + $0x70] sm:$0xff] }
 0x2cc   : >> { %2909 = vmatmul.bf16.gmra.mxu0 %v2718_v16  ;;  %v2721_v32 = vsel %vm2710_vm6, %v2685_v30, %v2523_v63  ;;  %v2991_v63 = vpop.f32.mrf.mxu1 }
 0x2d1   : >> { %v2313_v24 = vpop.permute.xlu0 %2312  ;;  %v2425_v25 = vpop.permute.xlu1 %2424 }
 0x2d2   : >> { %v2661_v26 = vsel %vm1515_vm2, %v4832_v22, %v2313_v24 }
 0x2d3   : >> { %v2699_v28 = vsel %vm1581_vm4, %v2661_v26, %v2425_v25  ;;  %v2527_v14 = vpop.permute.xlu2 %2526 }
 0x2d4   : >> { %v2742_v29 = vsel %vm2710_vm6, %v2699_v28, %v2537_v10  ;;  %v2994_v11 = vpop.f32.mrf.mxu1 }
 0x2d5   : >> { %2949 = vmatmul.bf16.gmra.mxu2 %v2742_v29 }
 0x2d9   : >> { %v2301_v33 = vpop.permute.xlu0 %2300  ;;  %v2413_v34 = vpop.permute.xlu1 %2412 }
 0x2da   : >> { %v2643_v40 = vsel %vm1515_vm2, %v4826_v37, %v2301_v33 }
 0x2db   : >> { %v2687_v43 = vsel %vm1581_vm4, %v2643_v40, %v2413_v34  ;;  %v2541_v47 = vpop.permute.xlu2 %2540 }
 0x2dc   : >> { %2914 = vmatmul.bf16.gmra.mxu0 %v2721_v32  ;;  %v2724_v44 = vsel %vm2710_vm6, %v2687_v43, %v2525_v20  ;;  %v4905_v20 = vld [vmem:[%s5868_s29 + $0x88] sm:$0xff]  ;;  %v2996_v22 = vpop.f32.mrf.mxu1 }
 0x2dd   : >> { %4643 = vmatmul.msk.bf16.gmra.mxu3 %vm1515_vm2, %v4905_v20 }
 0x2e1   : >> { %v2315_v17 = vpop.permute.xlu0 %2314  ;;  %v2427_v38 = vpop.permute.xlu1 %2426 }
 0x2e2   : >> { %v2664_v39 = vsel %vm1515_vm2, %v4833_v36, %v2315_v17 }
 0x2e3   : >> { %v2701_v41 = vsel %vm1581_vm4, %v2664_v39, %v2427_v38  ;;  %v2529_v58 = vpop.permute.xlu2 %2528  ;;  %v6089_v39 = vld [vmem:[%s6444_s6] ss:$0 sm:$0xff] }
 0x2e4   : >> { %v2745_v42 = vsel %vm2710_vm6, %v2701_v41, %v2539_v31  ;;  %v4837_v31 = vld [vmem:[%s5868_s29 + $0x78] sm:$0xff]  ;;  %v2999_v34 = vpop.f32.mrf.mxu1  ;;  %s5055_s29 = sshra.s32 (%p1952_p0), %s3478_s20, 4  ;;  %s5056_s29 = int_to_ptr.hbm [resolvable:$true] %s5055_s29 }
 0x2e5   : >> { %2954 = vmatmul.bf16.gmra.mxu2 %v2745_v42  ;;  %s5057_s15 = scalar_lea.hbm (%p1952_p0), %s5056_s29, 8  ;;  %p5062_p4 = scmp.lt.s32.totalorder (%p1952_p0), %s5056_s29, %s6451_s13 }
 0x2e6   : > { %p5058_p1 = scmp.ne.s32.totalorder (%p1952_p0), %s5056_s29, %s5057_s15  ;;  %p5063_p5 = scmp.lt.s32.totalorder (%p1952_p0), %s5061_s17, %s5057_s15 }
 0x2e8   : > { %p5059_p2 = pnand (%p1952_p0), %p5058_p1, %p5245_p6  ;;  %p5064_p7 = por (%p1952_p0), %p5063_p5, %p5062_p4 }
 0x2e9   : >> { %v2303_v45 = vpop.permute.xlu0 %2302  ;;  %v2415_v46 = vpop.permute.xlu1 %2414 }
 0x2ea   : >> { %v2646_v55 = vsel %vm1515_vm2, %v4827_v50, %v2303_v45  ;;  %v6097_v45 = vld [vmem:[%s6445_s7] ss:$0 sm:$0xff]  ;;  %p5060_p3 = pneg (%p1952_p0), %p5059_p2 }
 0x2eb   : >> { %v2689_v59 = vsel %vm1581_vm4, %v2646_v55, %v2415_v46  ;;  %v2543_v2 = vpop.permute.xlu2 %2542 }
 0x2ec   : >> { %2919 = vmatmul.bf16.gmra.mxu0 %v2724_v44  ;;  %v2727_v60 = vsel %vm2710_vm6, %v2689_v59, %v2527_v14  ;;  %v3001_v38 = vpop.f32.mrf.mxu1  ;;  %p5065_p10 = pnand (%p1952_p0), %p5064_p7, %p5060_p3 }
 0x2f1   : >> { %v2317_v51 = vpop.permute.xlu0 %2316  ;;  %v2429_v52 = vpop.permute.xlu1 %2428 }
 0x2f2   : >> { %v2667_v54 = vsel %vm1515_vm2, %v4834_v49, %v2317_v51  ;;  %v6104_v49 = vld [vmem:[%s6446_s8] ss:$0 sm:$0xff] }
 0x2f3   : >> { %v2703_v56 = vsel %vm1581_vm4, %v2667_v54, %v2429_v52  ;;  %v2531_v13 = vpop.permute.xlu2 %2530 }
 0x2f4   : >> { %v2748_v57 = vsel %vm2710_vm6, %v2703_v56, %v2541_v47  ;;  %v6092_v43 = vpop.f32.mrf.mxu1 }
 0x2f5   : >> { %2959 = vmatmul.bf16.gmra.mxu2 %v2748_v57  ;;  %v3034_v57 = vpop.f32.mrf.mxu3 }
 0x2f9   : >> { %v2305_v61 = vpop.permute.xlu0 %2304  ;;  %v2417_v62 = vpop.permute.xlu1 %2416 }
 0x2fa   : >> { %v2649_v7 = vsel %vm1515_vm2, %v4828_v3, %v2305_v61 }
 0x2fb   : >> { %v2691_v12 = vsel %vm1581_vm4, %v2649_v7, %v2417_v62  ;;  %v2545_v23 = vpop.permute.xlu2 %2544 }
 0x2fc   : >> { %2924 = vmatmul.bf16.gmra.mxu0 %v2727_v60  ;;  %v2730_v15 = vsel %vm2710_vm6, %v2691_v12, %v2529_v58  ;;  %v6106_v52 = vpop.f32.mrf.mxu1 }
 0x2fd   : >> { %v3036_v7 = vpop.f32.mrf.mxu3 }
 0x301   : >> { %v2319_v4 = vpop.permute.xlu0 %2318  ;;  %v2431_v5 = vpop.permute.xlu1 %2430 }
 0x302   : >> { %v2670_v6 = vsel %vm1515_vm2, %v4835_v1, %v2319_v4 }
 0x303   : >> { %v2705_v8 = vsel %vm1581_vm4, %v2670_v6, %v2431_v5  ;;  %v2547_v14 = vpop.permute.xlu2 %2546 }
 0x304   : >> { %v2751_v10 = vsel %vm2710_vm6, %v2705_v8, %v2543_v2  ;;  %v6119_v4 = vpop.f32.mrf.mxu1 }
 0x305   : >> { %2964 = vmatmul.bf16.gmra.mxu2 %v2751_v10 }
 0x309   : >> { %v2307_v16 = vpop.permute.xlu0 %2306  ;;  %v2419_v18 = vpop.permute.xlu1 %2418 }
 0x30a   : >> { %v2652_v27 = vsel %vm1515_vm2, %v4829_v21, %v2307_v16 }
 0x30b   : >> { %v2693_v30 = vsel %vm1581_vm4, %v2652_v27, %v2419_v18 }
 0x30c   : >> { %2929 = vmatmul.bf16.gmra.mxu0 %v2730_v15  ;;  %v2733_v32 = vsel %vm2710_vm6, %v2693_v30, %v2531_v13 }
 0x311   : >> { %v2321_v24 = vpop.permute.xlu0 %2320  ;;  %v2433_v25 = vpop.permute.xlu1 %2432 }
 0x312   : >> { %v2673_v26 = vsel %vm1515_vm2, %v4836_v19, %v2321_v24 }
 0x313   : >> { %v2707_v28 = vsel %vm1581_vm4, %v2673_v26, %v2433_v25  ;;  %v3039_v26 = vpop.f32.mrf.mxu3 }
 0x314   : >> { %v2754_v29 = vsel %vm2710_vm6, %v2707_v28, %v2545_v23  ;;  %v6130_v23 = vpop.f32.mrf.mxu1 }
 0x315   : >> { %2969 = vmatmul.bf16.gmra.mxu2 %v2754_v29 }
 0x319   : >> { %v2323_v33 = vpop.permute.xlu0 %2322  ;;  %v2435_v36 = vpop.permute.xlu1 %2434 }
 0x31a   : >> { %v2676_v35 = vsel %vm1515_vm2, %v4837_v31, %v2323_v33 }
 0x31b   : >> { %v2709_v37 = vsel %vm1581_vm4, %v2676_v35, %v2435_v36 }
 0x31c   : >> { %2934 = vmatmul.bf16.gmra.mxu0 %v2733_v32  ;;  %v2757_v17 = vsel %vm2710_vm6, %v2709_v37, %v2547_v14 }
 0x325   : >> { %2974 = vmatmul.bf16.gmra.mxu2 %v2757_v17 }
 0x329   : >> { %v2900_v40 = vpop.f32.mrf.mxu0 }
 0x32a   : >> { %v2901_v41 = vadd.f32 %v6089_v39, %v2900_v40  ;;  %v6140_v40 = vpop.f32.mrf.mxu3 }
 0x32c   : >> { %v2990_v42 = vadd.f32 %v2989_v53, %v2901_v41 }
 0x32e   : >> { %v3069_v44 = vmax.f32 %v2990_v42, 0.0 }
 0x330   : >> { %v3105_v48 = vmul.f32 %v6097_v45, %v3069_v44 }
 0x331   : >> { %v2902_v46 = vpop.f32.mrf.mxu0 }
 0x332   : >> { %v2903_v47 = vadd.f32 %v6089_v39, %v2902_v46  ;;  %v3141_v53 = vadd.f32 %v6104_v49, %v3105_v48 }
 0x334   : >> { %v2992_v50 = vadd.f32 %v2991_v63, %v2903_v47  ;;  %v3173_v60 = vsel %vm1515_vm2, %v3141_v53, 0.0 }
 0x336   : >> { %v3070_v51 = vmax.f32 %v2992_v50, 0.0 }
 0x338   : >> { %v3106_v54 = vmul.f32 %v6097_v45, %v3070_v51  ;;  %v6110_v55 = vpop.f32.mrf.mxu2 }
 0x339   : >> { %v2905_v56 = vpop.f32.mrf.mxu0 }
 0x33a   : >> { %v3142_v58 = vadd.f32 %v6104_v49, %v3106_v54  ;;  %v2906_v59 = vadd.f32 %v6089_v39, %v2905_v56 }
 0x33c   : >> { %v3174_v61 = vsel %vm1515_vm2, %v3142_v58, 0.0  ;;  %v2995_v62 = vadd.f32 %v2994_v11, %v2906_v59  ;;  %v6153_v59 = vpop.f32.mrf.mxu3 }
 0x33d   : >> { %v3175_v63 = vadd.f32 %v3174_v61, %v3173_v60 }
 0x33e   : >> { %v3071_v0 = vmax.f32 %v2995_v62, 0.0 }
 0x340   : >> { %v3107_v1 = vmul.f32 %v6097_v45, %v3071_v0  ;;  %v6117_v2 = vpop.f32.mrf.mxu2 }
 0x341   : >> { %v2907_v3 = vpop.f32.mrf.mxu0 }
 0x342   : >> { %v3143_v5 = vadd.f32 %v6104_v49, %v3107_v1  ;;  %v2908_v6 = vadd.f32 %v6089_v39, %v2907_v3 }
 0x344   : >> { %v3176_v8 = vsel %vm1515_vm2, %v3143_v5, 0.0  ;;  %v2997_v10 = vadd.f32 %v2996_v22, %v2908_v6  ;;  %v6161_v3 = vpop.f32.mrf.mxu3 }
 0x345   : >> { %v3177_v12 = vadd.f32 %v3176_v8, %v3175_v63 }
 0x346   : >> { %v3072_v13 = vmax.f32 %v2997_v10, 0.0 }
 0x348   : >> { %v3108_v11 = vmul.f32 %v6097_v45, %v3072_v13  ;;  %v2945_v15 = vpop.f32.mrf.mxu2 }
 0x349   : >> { %v2910_v16 = vpop.f32.mrf.mxu0  ;;  %v2946_v18 = vadd.f32 %v6089_v39, %v2945_v15 }
 0x34a   : >> { %v3144_v19 = vadd.f32 %v6104_v49, %v3108_v11  ;;  %v2911_v20 = vadd.f32 %v6089_v39, %v2910_v16 }
 0x34b   : >> { %v6128_v21 = vadd.f32 %v3034_v57, %v2946_v18 }
 0x34c   : >> { %v3178_v24 = vsel %vm1515_vm2, %v3144_v19, 0.0  ;;  %v3000_v25 = vadd.f32 %v2999_v34, %v2911_v20  ;;  %v3014_v34 = vpop.f32.mrf.mxu1  ;;  %v6165_v8 = vpop.f32.mrf.mxu3 }
 0x34d   : >> { %v3179_v22 = vadd.f32 %v3178_v24, %v3177_v12 }
 0x34e   : >> { %v3073_v27 = vmax.f32 %v3000_v25, 0.0 }
 0x350   : >> { %v3109_v28 = vmul.f32 %v6097_v45, %v3073_v27  ;;  %v2947_v29 = vpop.f32.mrf.mxu2 }
 0x351   : >> { %v2912_v30 = vpop.f32.mrf.mxu0  ;;  %v2948_v31 = vadd.f32 %v6089_v39, %v2947_v29 }
 0x352   : >> { %v3145_v32 = vadd.f32 %v6104_v49, %v3109_v28  ;;  %v2913_v33 = vadd.f32 %v6089_v39, %v2912_v30 }
 0x353   : >> { %v6137_v35 = vadd.f32 %v3036_v7, %v2948_v31 }
 0x354   : >> { %v3180_v36 = vsel %vm1515_vm2, %v3145_v32, 0.0  ;;  %v3002_v37 = vadd.f32 %v3001_v38, %v2913_v33  ;;  %v3016_v53 = vpop.f32.mrf.mxu1  ;;  %v6169_v11 = vpop.f32.mrf.mxu3 }
 0x355   : >> { %v3181_v14 = vadd.f32 %v3180_v36, %v3179_v22 }
 0x356   : >> { %v3074_v17 = vmax.f32 %v3002_v37, 0.0 }
 0x358   : >> { %v3110_v41 = vmul.f32 %v6097_v45, %v3074_v17  ;;  %v2950_v42 = vpop.f32.mrf.mxu2 }
 0x359   : >> { %v2915_v44 = vpop.f32.mrf.mxu0  ;;  %v2951_v46 = vadd.f32 %v6089_v39, %v2950_v42 }
 0x35a   : >> { %v2916_v47 = vadd.f32 %v6089_v39, %v2915_v44  ;;  %v3146_v50 = vadd.f32 %v6104_v49, %v3110_v41 }
 0x35b   : >> { %v6145_v48 = vadd.f32 %v3039_v26, %v2951_v46 }
 0x35c   : >> { %v3005_v51 = vadd.f32 %v6092_v43, %v2916_v47  ;;  %v3182_v54 = vsel %vm1515_vm2, %v3146_v50, 0.0  ;;  %v3019_v1 = vpop.f32.mrf.mxu1  ;;  %v6180_v26 = vpop.f32.mrf.mxu3 }
 0x35d   : >> { %v3183_v61 = vadd.f32 %v3182_v54, %v3181_v14 }
 0x35e   : >> { %v3075_v38 = vmax.f32 %v3005_v51, 0.0 }
 0x360   : >> { %v3111_v56 = vmul.f32 %v6097_v45, %v3075_v38  ;;  %v6151_v57 = vpop.f32.mrf.mxu2 }
 0x361   : >> { %v2917_v58 = vpop.f32.mrf.mxu0 }
 0x362   : >> { %v3147_v60 = vadd.f32 %v6104_v49, %v3111_v56  ;;  %v2918_v18 = vadd.f32 %v6089_v39, %v2917_v58 }
 0x364   : >> { %v3184_v62 = vsel %vm1515_vm2, %v3147_v60, 0.0  ;;  %v3021_v7 = vpop.f32.mrf.mxu1  ;;  %v3007_v25 = vadd.f32 %v6106_v52, %v2918_v18  ;;  %v6192_v46 = vpop.f32.mrf.mxu3 }
 0x365   : >> { %v6157_v63 = vadd.f32 %v3184_v62, %v3183_v61  ;;  %v2941_v61 = vadd.f32 %v6089_v39, %v6110_v55 }
 0x366   : >> { %v3076_v30 = vmax.f32 %v3007_v25, 0.0 }
 0x368   : >> { %v6159_v0 = vpop.f32.mrf.mxu2  ;;  %v3112_v52 = vmul.f32 %v6097_v45, %v3076_v30 }
 0x369   : >> { %v2920_v43 = vpop.f32.mrf.mxu0 }
 0x36a   : >> { %v2921_v20 = vadd.f32 %v6089_v39, %v2920_v43 }
 0x36c   : >> { %v3024_v13 = vpop.f32.mrf.mxu1  ;;  %v3010_v28 = vadd.f32 %v6119_v4, %v2921_v20  ;;  %v6209_v18 = vpop.f32.mrf.mxu3 }
 0x36e   : >> { %v3077_v33 = vmax.f32 %v3010_v28, 0.0 }
 0x370   : >> { %v6163_v5 = vpop.f32.mrf.mxu2 }
 0x371   : >> { %v2922_v6 = vpop.f32.mrf.mxu0 }
 0x372   : >> { %v2923_v27 = vadd.f32 %v6089_v39, %v2922_v6 }
 0x374   : >> { %v6174_v19 = vpop.f32.mrf.mxu1  ;;  %v3012_v31 = vadd.f32 %v6130_v23, %v2923_v27  ;;  %v3113_v23 = vmul.f32 %v6097_v45, %v3077_v33 }
 0x376   : >> { %v3078_v41 = vmax.f32 %v3012_v31, 0.0  ;;  %v3149_v56 = vadd.f32 %v6104_v49, %v3113_v23 }
 0x378   : >> { %v6167_v10 = vpop.f32.mrf.mxu2  ;;  %v3114_v51 = vmul.f32 %v6097_v45, %v3078_v41  ;;  %v3188_v20 = vsel %vm1515_vm2, %v3149_v56, 0.0  ;;  %v2956_v56 = vadd.f32 %v6089_v39, %v6159_v0  ;;  %v3088_v0 = vmax.f32 %v6137_v35, 0.0 }
 0x379   : >> { %v2925_v12 = vpop.f32.mrf.mxu0 }
 0x37a   : >> { %v2926_v29 = vadd.f32 %v6089_v39, %v2925_v12 }
 0x37c   : >> { %v3015_v36 = vadd.f32 %v3014_v34, %v2926_v29  ;;  %v3029_v44 = vpop.f32.mrf.mxu1  ;;  %v3148_v34 = vadd.f32 %v6104_v49, %v3112_v52 }
 0x37d   : >> { %v3030_v27 = vadd.f32 %v3029_v44, %v2941_v61 }
 0x37e   : >> { %v3079_v47 = vmax.f32 %v3015_v36, 0.0  ;;  %v3186_v62 = vsel %vm1515_vm2, %v3148_v34, 0.0 }
 0x37f   : >> { %v3187_v29 = vadd.f32 %v3186_v62, %v6157_v63  ;;  %v3085_v63 = vmax.f32 %v3030_v27, 0.0  ;;  %v3087_v62 = vmax.f32 %v6128_v21, 0.0  ;;  %v3045_v21 = vadd.f32 %v6153_v59, %v2956_v56 }
 0x380   : >> { %v6171_v15 = vpop.f32.mrf.mxu2  ;;  %v3115_v58 = vmul.f32 %v6097_v45, %v3079_v47  ;;  %v2953_v47 = vadd.f32 %v6089_v39, %v6151_v57 }
 0x381   : >> { %v2927_v16 = vpop.f32.mrf.mxu0  ;;  %v3189_v33 = vadd.f32 %v3188_v20, %v3187_v29  ;;  %v3121_v61 = vmul.f32 %v6097_v45, %v3085_v63  ;;  %v3089_v20 = vmax.f32 %v6145_v48, 0.0  ;;  %v3124_v48 = vmul.f32 %v6097_v45, %v3088_v0 }
 0x382   : >> { %v2928_v32 = vadd.f32 %v6089_v39, %v2927_v16  ;;  %v2943_v16 = vadd.f32 %v6089_v39, %v6117_v2  ;;  %v3151_v25 = vadd.f32 %v6104_v49, %v3115_v58  ;;  %v2963_v59 = vadd.f32 %v6089_v39, %v6171_v15 }
 0x383   : >> { %v3160_v63 = vadd.f32 %v6104_v49, %v3124_v48 }
 0x384   : >> { %v3017_v42 = vadd.f32 %v3016_v53, %v2928_v32  ;;  %v3031_v28 = vpop.f32.mrf.mxu1 }
 0x385   : >> { %v3032_v36 = vadd.f32 %v3031_v28, %v2943_v16 }
 0x386   : >> { %v3080_v38 = vmax.f32 %v3017_v42, 0.0 }
 0x387   : >> { %v3086_v34 = vmax.f32 %v3032_v36, 0.0 }
 0x388   : >> { %v6177_v24 = vpop.f32.mrf.mxu2  ;;  %v3116_v6 = vmul.f32 %v6097_v45, %v3080_v38 }
 0x389   : >> { %v2930_v22 = vpop.f32.mrf.mxu0 }
 0x38a   : >> { %v2931_v37 = vadd.f32 %v6089_v39, %v2930_v22  ;;  %v3152_v31 = vadd.f32 %v6104_v49, %v3116_v6  ;;  %v2958_v6 = vadd.f32 %v6089_v39, %v6163_v5  ;;  %v2961_v5 = vadd.f32 %v6089_v39, %v6167_v10 }
 0x38c   : >> { %v3020_v50 = vadd.f32 %v3019_v1, %v2931_v37  ;;  %v3150_v1 = vadd.f32 %v6104_v49, %v3114_v51  ;;  %v3192_v37 = vsel %vm1515_vm2, %v3151_v25, 0.0  ;;  %v3047_v35 = vadd.f32 %v6161_v3, %v2958_v6 }
 0x38d   : >> { %v3050_v3 = vadd.f32 %v6165_v8, %v2961_v5 }
 0x38e   : >> { %v3081_v53 = vmax.f32 %v3020_v50, 0.0  ;;  %v3190_v30 = vsel %vm1515_vm2, %v3150_v1, 0.0  ;;  %v3042_v1 = vadd.f32 %v6140_v40, %v2953_v47  ;;  %v3123_v40 = vmul.f32 %v6097_v45, %v3087_v62 }
 0x390   : >> { %v6188_v14 = vpop.f32.mrf.mxu2  ;;  %v3117_v55 = vmul.f32 %v6097_v45, %v3081_v53  ;;  %v6233_v53 = vpop.f32.mrf.mxu3  ;;  %v3090_v27 = vmax.f32 %v3042_v1, 0.0  ;;  %v3159_v36 = vadd.f32 %v6104_v49, %v3123_v40 }
 0x391   : >> { %v2932_v17 = vpop.f32.mrf.mxu0 }
 0x392   : >> { %v2933_v4 = vadd.f32 %v6089_v39, %v2932_v17  ;;  %v3153_v52 = vadd.f32 %v6104_v49, %v3117_v55  ;;  %v3157_v55 = vadd.f32 %v6104_v49, %v3121_v61 }
 0x394   : >> { %v3022_v54 = vadd.f32 %v3021_v7, %v2933_v4  ;;  %v3194_v4 = vsel %vm1515_vm2, %v3152_v31, 0.0  ;;  %v3196_v51 = vsel %vm1515_vm2, %v3153_v52, 0.0  ;;  %v3126_v52 = vmul.f32 %v6097_v45, %v3090_v27 }
 0x396   : >> { %v3082_v12 = vmax.f32 %v3022_v54, 0.0 }
 0x398   : >> { %v6199_v60 = vpop.f32.mrf.mxu2  ;;  %v3118_v32 = vmul.f32 %v6097_v45, %v3082_v12  ;;  %v3064_v15 = vpop.f32.mrf.mxu3 }
 0x399   : >> { %v2935_v43 = vpop.f32.mrf.mxu0 }
 0x39a   : >> { %v2936_v7 = vadd.f32 %v6089_v39, %v2935_v43  ;;  %v3154_v44 = vadd.f32 %v6104_v49, %v3118_v32  ;;  %v3125_v32 = vmul.f32 %v6097_v45, %v3089_v20 }
 0x39c   : >> { %v3025_v22 = vadd.f32 %v3024_v13, %v2936_v7  ;;  %v3191_v13 = vadd.f32 %v3190_v30, %v3189_v33  ;;  %v3198_v57 = vsel %vm1515_vm2, %v3154_v44, 0.0  ;;  %v3204_v33 = vsel %vm1515_vm2, %v3157_v55, 0.0 }
 0x39d   : >> { %v2968_v44 = vadd.f32 %v6089_v39, %v6188_v14  ;;  %v3210_v14 = vsel %vm1515_vm2, %v3160_v63, 0.0 }
 0x39e   : >> { %v3083_v2 = vmax.f32 %v3025_v22, 0.0  ;;  %v3193_v50 = vadd.f32 %v3192_v37, %v3191_v13  ;;  %v2966_v37 = vadd.f32 %v6089_v39, %v6177_v24  ;;  %v3208_v24 = vsel %vm1515_vm2, %v3159_v36, 0.0 }
 0x3a0   : >> { %v3119_v17 = vmul.f32 %v6097_v45, %v3083_v2  ;;  %v6221_v42 = vpop.f32.mrf.mxu2  ;;  %v3195_v58 = vadd.f32 %v3194_v4, %v3193_v50  ;;  %v3091_v2 = vmax.f32 %v3045_v21, 0.0  ;;  %v3052_v4 = vadd.f32 %v6169_v11, %v2963_v59  ;;  %v3066_v55 = vpop.f32.mrf.mxu3 }
 0x3a1   : >> { %v2937_v41 = vpop.f32.mrf.mxu0  ;;  %v3093_v50 = vmax.f32 %v3050_v3, 0.0  ;;  %v2973_v61 = vadd.f32 %v6089_v39, %v6221_v42 }
 0x3a2   : >> { %v2938_v23 = vadd.f32 %v6089_v39, %v2937_v41  ;;  %v3155_v38 = vadd.f32 %v6104_v49, %v3119_v17  ;;  %v3197_v12 = vadd.f32 %v3196_v51, %v3195_v58  ;;  %v3092_v17 = vmax.f32 %v3047_v35, 0.0 }
 0x3a3   : >> { %v3127_v8 = vmul.f32 %v6097_v45, %v3091_v2  ;;  %v2971_v51 = vadd.f32 %v6089_v39, %v6199_v60  ;;  %v3094_v56 = vmax.f32 %v3052_v4, 0.0  ;;  %v3057_v58 = vadd.f32 %v6192_v46, %v2968_v44 }
 0x3a4   : >> { %v3027_v54 = vadd.f32 %v6174_v19, %v2938_v23  ;;  %v3122_v19 = vmul.f32 %v6097_v45, %v3086_v34  ;;  %v3200_v7 = vsel %vm1515_vm2, %v3155_v38, 0.0  ;;  %v3199_v25 = vadd.f32 %v3198_v57, %v3197_v12 }
 0x3a5   : >> { %v3161_v23 = vadd.f32 %v6104_v49, %v3125_v32  ;;  %v3055_v34 = vadd.f32 %v6180_v26, %v2966_v37  ;;  %v3162_v38 = vadd.f32 %v6104_v49, %v3126_v52  ;;  %v3128_v11 = vmul.f32 %v6097_v45, %v3092_v17 }
 0x3a6   : >> { %v3084_v43 = vmax.f32 %v3027_v54, 0.0  ;;  %v3201_v28 = vadd.f32 %v3200_v7, %v3199_v25  ;;  %v3158_v30 = vadd.f32 %v6104_v49, %v3122_v19  ;;  %v3163_v26 = vadd.f32 %v6104_v49, %v3127_v8 }
 0x3a7   : >> { %v3212_v62 = vsel %vm1515_vm2, %v3161_v23, 0.0  ;;  %v3129_v60 = vmul.f32 %v6097_v45, %v3093_v50  ;;  %v3095_v1 = vmax.f32 %v3055_v34, 0.0  ;;  %v3060_v6 = vadd.f32 %v6209_v18, %v2971_v51 }
 0x3a8   : >> { %v3120_v16 = vmul.f32 %v6097_v45, %v3084_v43  ;;  %v2975_v29 = vpop.f32.mrf.mxu2  ;;  %v3206_v41 = vsel %vm1515_vm2, %v3158_v30, 0.0  ;;  %v3214_v19 = vsel %vm1515_vm2, %v3162_v38, 0.0  ;;  %v3164_v46 = vadd.f32 %v6104_v49, %v3128_v11 }
 0x3a9   : >> { %v2976_v12 = vadd.f32 %v6089_v39, %v2975_v29  ;;  %v3130_v42 = vmul.f32 %v6097_v45, %v3094_v56  ;;  %v3096_v7 = vmax.f32 %v3057_v58, 0.0  ;;  %v3216_v21 = vsel %vm1515_vm2, %v3163_v26, 0.0  ;;  %v4656_v58 = vld [vmem:[%s6447_s9 + $0x18] sm:$0xf0] (%p1952_p0) }
 0x3aa   : >> { %v3156_v22 = vadd.f32 %v6104_v49, %v3120_v16  ;;  %v3062_v16 = vadd.f32 %v6233_v53, %v2973_v61  ;;  %v3165_v18 = vadd.f32 %v6104_v49, %v3129_v60  ;;  %v3131_v40 = vmul.f32 %v6097_v45, %v3095_v1  ;;  %v4646_v61 = vld [vmem:[%s6447_s9] sm:$0xf] (%p1952_p0)  ;;  %v4927_v1 = vld [vmem:[%s6449_s11 + $0x38] sm:$0xff] (%p1952_p0) }
 0x3ab   : >> { %v3097_v5 = vmax.f32 %v3060_v6, 0.0  ;;  %v3218_v27 = vsel %vm1515_vm2, %v3164_v46, 0.0  ;;  %v3132_v29 = vmul.f32 %v6097_v45, %v3096_v7  ;;  %3435 = vmatpush.bf16.msra.mxu2 (%p1952_p0), %v4927_v1  ;;  %v4926_v46 = vld [vmem:[%s6449_s11 + $0x30] sm:$0xff] (%p1952_p0)  ;;  %v4925_v7 = vld [vmem:[%s6449_s11 + $0x28] sm:$0xff] (%p1952_p0) }
 0x3ac   : >> { %v3202_v31 = vsel %vm1515_vm2, %v3156_v22, 0.0  ;;  %v3065_v22 = vadd.f32 %v3064_v15, %v2976_v12  ;;  %v3098_v53 = vmax.f32 %v3062_v16, 0.0  ;;  %v3220_v48 = vsel %vm1515_vm2, %v3165_v18, 0.0  ;;  %v4935_v12 = vld [vmem:[%s6449_s11 + $0x78] sm:$0xff] (%p1952_p0)  ;;  %v4933_v16 = vld [vmem:[%s6449_s11 + $0x68] sm:$0xff] (%p1952_p0)  ;;  %v4922_v18 = vld [vmem:[%s6449_s11 + $0x10] sm:$0xff] (%p1952_p0) }
 0x3ad   : >> { %v3203_v10 = vadd.f32 %v3202_v31, %v3201_v28  ;;  %v3166_v28 = vadd.f32 %v6104_v49, %v3130_v42  ;;  %v3167_v59 = vadd.f32 %v6104_v49, %v3131_v40  ;;  %v3133_v31 = vmul.f32 %v6097_v45, %v3097_v5  ;;  %3448 = vmatpush.bf16.msra.mxu3 (%p1952_p0), %v4935_v12  ;;  %v4930_v40 = vld [vmem:[%s6449_s11 + $0x50] sm:$0xff] (%p1952_p0)  ;;  %v4921_v5 = vld [vmem:[%s6449_s11 + $0x8] sm:$0xff] (%p1952_p0) }
 0x3ae   : >> { %v3099_v32 = vmax.f32 %v3065_v22, 0.0  ;;  %v3134_v36 = vmul.f32 %v6097_v45, %v3098_v53  ;;  %v4929_v22 = vld [vmem:[%s6449_s11 + $0x48] sm:$0xff] (%p1952_p0) }
 0x3af   : >> { %v3205_v13 = vadd.f32 %v3204_v33, %v3203_v10  ;;  %v3222_v10 = vsel %vm1515_vm2, %v3166_v28, 0.0  ;;  %v3168_v33 = vadd.f32 %v6104_v49, %v3132_v29  ;;  %v3224_v52 = vsel %vm1515_vm2, %v3167_v59, 0.0  ;;  %3436 = vmatpush.bf16.msra.mxu2 (%p1952_p0), %v4926_v46  ;;  %v3243_v28 = vld [vmem:[%s6448_s10] sm:$0x3] (%p1952_p0) }
 0x3b0   : >> { %v2977_v43 = vpop.f32.mrf.mxu2  ;;  %v3169_v17 = vadd.f32 %v6104_v49, %v3133_v31  ;;  %v3170_v63 = vadd.f32 %v6104_v49, %v3134_v36  ;;  %v3245_v29 = vperm.slane (%p1952_p0), %v3243_v28, 0  ;;  %v3246_v53 = vperm.slane (%p1952_p0), %v3243_v28, 1 }
 0x3b1   : >> { %v3207_v47 = vadd.f32 %v3206_v41, %v3205_v13  ;;  %v2978_v20 = vadd.f32 %v6089_v39, %v2977_v43  ;;  %v3135_v13 = vmul.f32 %v6097_v45, %v3099_v32  ;;  %v3226_v41 = vsel %vm1515_vm2, %v3168_v33, 0.0  ;;  %v4648_v43 = vld [vmem:[%s6447_s9 + $0x8] sm:$0xf0] (%p1952_p0) }
 0x3b2   : >> { %v3228_v23 = vsel %vm1515_vm2, %v3169_v17, 0.0 }
 0x3b3   : >> { %v3209_v54 = vadd.f32 %v3208_v24, %v3207_v47  ;;  %v3067_v30 = vadd.f32 %v3066_v55, %v2978_v20  ;;  %v3171_v8 = vadd.f32 %v6104_v49, %v3135_v13  ;;  %v3230_v24 = vsel %vm1515_vm2, %v3170_v63, 0.0  ;;  %3437 = vmatpush.bf16.msra.mxu2 (%p1952_p0), %v4925_v7  ;;  %v4924_v20 = vld [vmem:[%s6449_s11 + $0x20] sm:$0xff] (%p1952_p0)  ;;  %v4931_v55 = vld [vmem:[%s6449_s11 + $0x58] sm:$0xff] (%p1952_p0) }
 0x3b5   : >> { %v3211_v57 = vadd.f32 %v3210_v14, %v3209_v54  ;;  %v3100_v3 = vmax.f32 %v3067_v30, 0.0  ;;  %v3232_v51 = vsel %vm1515_vm2, %v3171_v8, 0.0 }
 0x3b7   : >> { %v3213_v0 = vadd.f32 %v3212_v62, %v3211_v57  ;;  %v3136_v4 = vmul.f32 %v6097_v45, %v3100_v3  ;;  %v4654_v45 = vld [vmem:[%s6447_s9 + $0x10] sm:$0xf] (%p1952_p0)  ;;  %v4917_v62 = vld [vmem:[%s6447_s9 + $0x4] sm:$0xf0] (%p1952_p0)  ;;  %v4916_v57 = vld [vmem:[%s6447_s9 + $0x4] sm:$0xf] (%p1952_p0)  ;;  %3438 = vmatpush.bf16.msra.mxu2 (%p1952_p0), %v4924_v20 }
 0x3b8   : > { %v4647_v6 = vor.u32 (%p1952_p0), %v4917_v62, %v4646_v61  ;;  %v5040_v3 = vld [vmem:[%s6450_s12] ss:$0 sm:$0xff] (%p1952_p0) }
 0x3b9   : >> { %v3215_v25 = vadd.f32 %v3214_v19, %v3213_v0  ;;  %v3172_v50 = vadd.f32 %v6104_v49, %v3136_v4  ;;  %v4919_v49 = vld [vmem:[%s6447_s9 + $0x14] sm:$0xf0] (%p1952_p0)  ;;  %v4651_v19 = vor.u32 (%p1952_p0), %v4916_v57, %v4648_v43  ;;  %v4934_v0 = vld [vmem:[%s6449_s11 + $0x70] sm:$0xff] (%p1952_p0) }
 0x3ba   : > { %v4655_v56 = vor.u32 (%p1952_p0), %v4919_v49, %v4654_v45  ;;  %3449 = vmatpush.bf16.msra.mxu3 (%p1952_p0), %v4934_v0 }
 0x3bb   : >> { %v3217_v35 = vadd.f32 %v3216_v21, %v3215_v25  ;;  %v3234_v11 = vsel %vm1515_vm2, %v3172_v50, 0.0  ;;  %v4932_v21 = vld [vmem:[%s6449_s11 + $0x60] sm:$0xff] (%p1952_p0)  ;;  %v4923_v25 = vld [vmem:[%s6449_s11 + $0x18] sm:$0xff] (%p1952_p0) }
 0x3bc   : > { %3279 = vmatpush.bf16.msra.mxu0 (%p1952_p0), %v4655_v56  ;;  %3439 = vmatpush.bf16.msra.mxu2 (%p1952_p0), %v4923_v25 }
 0x3bd   : >> { %v3219_v39 = vadd.f32 %v3218_v27, %v3217_v35  ;;  %v4920_v27 = vld [vmem:[%s6449_s11] sm:$0xff] (%p1952_p0) }
 0x3be   : > { %3450 = vmatpush.bf16.msra.mxu3 (%p1952_p0), %v4933_v16  ;;  %v4928_v35 = vld [vmem:[%s6449_s11 + $0x40] sm:$0xff] (%p1952_p0) }
 0x3bf   : >> { %v3221_v2 = vadd.f32 %v3220_v48, %v3219_v39 }
 0x3c0   : > { %3280 = vmatpush.bf16.msra.mxu0 (%p1952_p0), %v4647_v6  ;;  %3440 = vmatpush.bf16.msra.mxu2 (%p1952_p0), %v4922_v18 }
 0x3c1   : >> { %v3223_v37 = vadd.f32 %v3222_v10, %v3221_v2 }
 0x3c2   : > { %3451 = vmatpush.bf16.msra.mxu3 (%p1952_p0), %v4932_v21 }
 0x3c3   : >> { %v3225_v15 = vadd.f32 %v3224_v52, %v3223_v37 }
 0x3c4   : > { %3441 = vmatpush.bf16.msra.mxu2 (%p1952_p0), %v4921_v5 }
 0x3c5   : >> { %v3227_v44 = vadd.f32 %v3226_v41, %v3225_v15 }
 0x3c6   : > { %3452 = vmatpush.bf16.msra.mxu3 (%p1952_p0), %v4931_v55 }
 0x3c7   : >> { %v3229_v47 = vadd.f32 %v3228_v23, %v3227_v44 }
 0x3c8   : > { %3442 = vmatpush.bf16.msra.mxu2 (%p1952_p0), %v4920_v27 }
 0x3c9   : >> { %v3231_v34 = vadd.f32 %v3230_v24, %v3229_v47 }
 0x3ca   : > { %3453 = vmatpush.bf16.msra.mxu3 (%p1952_p0), %v4930_v40 }
 0x3cb   : >> { %v3233_v38 = vadd.f32 %v3232_v51, %v3231_v34 }
 0x3cd   : >> { %v3235_v54 = vadd.f32 %v3234_v11, %v3233_v38  ;;  %1954 = sbr.rel (!%p1952_p0) target bundleno = 552 (0x228), region = 190 }
 0x3ce   : > { %3454 = vmatpush.bf16.msra.mxu3 (%p1952_p0), %v4929_v22 }
 0x3cf   : >> { %v3236_v14 = vadd.f32 %v5123_v9, %v3235_v54  }
 0x3d1   : >> { %v6478_v9 = vmov %v3236_v14  ;;  %v3237_v60 = vmul.f32 (%p1952_p0), 0.015625, %v3236_v14 }
 0x3d2   : > { %v4918_v9 = vld [vmem:[%s6447_s9 + $0x14] sm:$0xf]  ;;  %3455 = vmatpush.bf16.msra.mxu3 %v4928_v35 }
 0x3d3   : > { %v4659_v26 = vor.u32 %v4918_v9, %v4656_v58  ;;  %v3238_v42 = vpack.c.bf16 %v3237_v60, %v3237_v60 }
 0x3d5   : > { %3292 = vmatpush.bf16.msra.mxu1 %v4659_v26  ;;  %4660 = vmatmul.msk.bf16.vlgmr.msra.gmra.mxu0 %vm1515_vm2, %v3238_v42 }
 0x3d9   : > { %3293 = vmatpush.bf16.msra.mxu1 %v4651_v19 }
 0x3dc   : > { %4661 = vmatmul.msk.bf16.vlgmr.msra.gmra.mxu1 %vm1515_vm2, %v3238_v42 }
 0x452   : > { %v3282_v30 = vpop.f32.mrf.mxu0 }
 0x453   : > { %v3283_v39 = vadd.f32 %v3282_v30, %v3245_v29 }
 0x455   : > { %v3299_v31 = vmax.f32 %v3283_v39, 0.0 }
 0x457   : > { %v3301_v2 = vpack.c.bf16 %v3299_v31, %v3299_v31 }
 0x459   : > { %v3295_v48 = vpop.f32.mrf.mxu1  ;;  %3443 = vmatmul.bf16.vlgmr.msra.gmra.mxu2 %v3301_v2 }
 0x45a   : > { %v3296_v59 = vadd.f32 %v3295_v48, %v3246_v53  ;;  %v3284_v33 = vpop.f32.mrf.mxu0 }
 0x45c   : > { %v3300_v32 = vmax.f32 %v3296_v59, 0.0 }
 0x45e   : > { %v3302_v10 = vpack.c.bf16 %v3300_v32, %v3300_v32 }
 0x460   : > { %3456 = vmatmul.bf16.vlgmr.msra.gmra.mxu3 %v3302_v10 }
 0x461   : > { %v3297_v36 = vpop.f32.mrf.mxu1 }
 0x4dc   : > { %v3444_v37 = vpop.f32.mrf.mxu2 }
 0x4dd   : > { %v3445_v52 = vadd.f32 %v5040_v3, %v3444_v37 }
 0x4e3   : > { %v3457_v17 = vpop.f32.mrf.mxu3 }
 0x4e4   : > { %v3458_v13 = vadd.f32 %v3457_v17, %v3445_v52 }
 0x4e6   : > { %3461 = vst [vmem:[%s5414_s23] sm:$0xff] %v3458_v13 }
 0x4e7   : > { %5068 = shalt.err (!%p5065_p10)
}
 0x4e8   : > { %4963 = dma.vmem_to_hbm [thread:$0]  (%p5245_p6), %s3476_s27, 128, %s3478_s20, %s3463_s0   ;;  %v3446_v15 = vpop.f32.mrf.mxu2 }
 0x4eb   : > { %v3459_v41 = vpop.f32.mrf.mxu3 }
 0x4ec PF: > { %s3489_s16 = sand.u32 1, %s5103_s25   ;;  %p4966_p11 = pnand %p3598_p9, %p5249_p8 }
 0x4ed   : > { %s3490_s23 = scalar_lea.sflag [#allocation5], %s3489_s16 }
 0x4ee   : > { %p4967_p12 = pneg %p4966_p11 }
 0x4f0   : > { %5098 = dma.done.wait (%p4967_p12), %s3490_s23, 128  }
 0x4f1   : > { %5100 = vsyncadd (%p4967_p12), %s3490_s23, 4294967168  ;;  %s6480_s21 = sld [smem:[#allocation7_spill]]  ;;  %p23_p6 = scmp.ge.s32.totalorder %s5230_s14, 4  }
 0x4f2   : > { %s6481_s27 = sld [smem:[#allocation8_spill]]  ;;  %s6482_s25 = smov %s5107_s26 }
 0x4f3   : > { %s6484_s28 = smov %s5230_s14  ;;  %25 = sbr.rel (!%p23_p6) target bundleno = 6 (0x6), region = 201 }
 0x4f7   : > { %s6483_s26 = smov %s6480_s21 }
 0x4f8   :  { %3496 = vsyncpa [#allocation5], 1 }
 0x4f9   :  { %3498 = vsyncpa [#allocation5 + $0x1], 1 }

</bundles_post_ra>
